<compile_context>
chip_gen: v7x
topology: tpu7x:2x2x1
jax: 0.10.0
libtpu: 0.0.40
codegen_flags: <defaults>
</compile_context>

<pallas_src>
import functools

import jax
import jax.numpy as jnp
from jax.experimental import pallas as pl
from jax.experimental.pallas import tpu as pltpu

OUT_PAD = 128          # lane-padded width of the 2-class output head
NEG_BIG = -1e30        # finite "-inf" used for masking (exp underflows to 0)


def _attention_logits(wh, a_att, valid, alpha):
    """e = LeakyReLU(Wh @ a_att) with padded rows masked to NEG_BIG (VPU/XLU only)."""
    s = jnp.sum(wh * a_att, axis=-1, keepdims=True)               # (TM, 1)
    e = jnp.where(s > 0.0, s, alpha * s)                          # LeakyReLU
    return jnp.where(valid, e, NEG_BIG)


def _vuln_kernel(alpha, n_true, tile_m,
                 x_ref, w_att_ref, a_att_ref, v_ref, w_combo_ref, b_combo_ref,
                 out_ref,
                 m_ref, l_ref, acc_ref, wh_ref):
    p = pl.program_id(0)            # 0: softmax statistics pass, 1: aggregation pass
    i = pl.program_id(1)            # node-row tile index
    n_tiles = pl.num_programs(1)

    @pl.when(jnp.logical_and(p == 0, i == 0))
    def _init():
        m_ref[...] = jnp.full_like(m_ref, NEG_BIG)
        l_ref[...] = jnp.zeros_like(l_ref)
        acc_ref[...] = jnp.zeros_like(acc_ref)

    # Padding mask derived in-kernel (no HBM bias input, no per-tile masked DMA).
    rows = i * tile_m + jax.lax.broadcasted_iota(jnp.int32, (tile_m, 1), 0)
    valid = rows < n_true

    @pl.when(p == 0)
    def _stats():
        # Wh = x @ W_att once per node tile (bf16 MXU, f32 accumulate).  Cached in
        # VMEM so pass 1 never re-runs this matmul nor re-streams x from HBM.
        wh = jnp.dot(x_ref[...], w_att_ref[...],
                     preferred_element_type=jnp.float32)          # (TM, H)
        wh_ref[i] = wh
        e = _attention_logits(wh, a_att_ref[...], valid, alpha)
        m_old = m_ref[...]
        m_new = jnp.maximum(m_old, jnp.max(e, axis=0, keepdims=True))
        l_ref[...] = (l_ref[...] * jnp.exp(m_old - m_new)
                      + jnp.sum(jnp.exp(e - m_new), axis=0, keepdims=True))
        m_ref[...] = m_new

    @pl.when(p == 1)
    def _aggregate():
        wh = wh_ref[i]                                            # cached f32 Wh tile
        e = _attention_logits(wh, a_att_ref[...], valid, alpha)
        att = jnp.exp(e - m_ref[...]) * pl.reciprocal(l_ref[...], approx=True)
        t = att * wh
        h1 = jnp.where(t > 0.0, t, jnp.exp(t) - 1.0)              # ELU (f32, matches ref)
        # v carries the A_norm column sums, the 1/N of the final mean, and zeros
        # on pad rows: the whole GCN aggregation + mean is one weighted row-sum.
        acc_ref[...] += jnp.sum(v_ref[...] * h1, axis=0, keepdims=True)   # (1, H)

    @pl.when(jnp.logical_and(p == 1, i == n_tiles - 1))
    def _finalize():
        # W_combo = W_gcn @ W_out.T (lane-padded to 128); b_combo padded with -1e30
        # so the 126 fake lanes vanish under the softmax below.
        logits = (jnp.dot(acc_ref[...], w_combo_ref[...],
                          preferred_element_type=jnp.float32)
                  + b_combo_ref[...])                             # (1, OUT_PAD)
        mx = jnp.max(logits, axis=-1, keepdims=True)
        ex = jnp.exp(logits - mx)
        # Exact divide here: this runs exactly once, so approx buys nothing.
        out_ref[...] = ex / jnp.sum(ex, axis=-1, keepdims=True)


def _round_up(x, m):
    return ((x + m - 1) // m) * m


def _normalized_adjacency(edge_index, num_nodes):
    """Dense symmetric GCN normalization D^-1/2 (A + I) D^-1/2 (glue-side only)."""
    a = jnp.zeros((num_nodes, num_nodes), jnp.float32)
    a = a.at[edge_index[0], edge_index[1]].set(1.0)
    idx = jnp.arange(num_nodes)
    a = a.at[idx, idx].set(1.0)                      # self loops
    deg = jnp.sum(a, axis=1)
    d_inv_sqrt = jax.lax.rsqrt(deg)
    return d_inv_sqrt[:, None] * a * d_inv_sqrt[None, :]


def vulnerability_detection_forward(features, edge_index, params, *,
                                    alpha=0.2, tile_m=256):
    """Pallas forward of VulnerabilityDetection (eval mode). Returns (1, 2)."""
    assert tile_m % 16 == 0, "row tile must be a multiple of the bf16 sublane pack"
    n_true, hidden = features.shape
    n_pad = _round_up(max(n_true, tile_m), tile_m)
    n_tiles = n_pad // tile_m

    # ---- glue-side precompute #1: collapse GCN aggregation + mean into v -----
    #   mean_n(A_norm @ Z + b_gcn) = ((1/N) 1^T A_norm) @ Z + b_gcn = v @ Z + b_gcn
    a_norm = _normalized_adjacency(edge_index, n_true)
    v = jnp.sum(a_norm, axis=0) / n_true                              # (N,)
    v_pad = jnp.zeros((n_pad, 1), jnp.float32).at[:n_true, 0].set(v)

    # ---- glue-side precompute #2: fold W_gcn into the output head ------------
    #   (v @ h1) @ W_gcn @ W_out.T + (b_gcn @ W_out.T + b_out)
    w_gcn = params["w_gcn"].astype(jnp.float32)                       # (H, H)
    w_out = params["w_out"].astype(jnp.float32)                       # (2, H)
    b_gcn = params["b_gcn"].astype(jnp.float32)
    b_out = params["b_out"].astype(jnp.float32)
    w_combo = w_gcn @ w_out.T                                         # (H, 2)
    b_combo = b_gcn @ w_out.T + b_out                                 # (2,)
    w_combo_pad = jnp.zeros((hidden, OUT_PAD), jnp.float32).at[:, :2].set(w_combo)
    b_combo_pad = jnp.full((1, OUT_PAD), NEG_BIG, jnp.float32).at[0, :2].set(b_combo)

    x_pad = jnp.zeros((n_pad, hidden), jnp.bfloat16)
    x_pad = x_pad.at[:n_true].set(features.astype(jnp.bfloat16))
    w_att = params["w_att"].astype(jnp.bfloat16)                      # (H, H)
    a_att = params["a_att"].reshape(1, hidden).astype(jnp.float32)

    grid_spec = pltpu.PrefetchScalarGridSpec(
        num_scalar_prefetch=0,
        grid=(2, n_tiles),                                            # (pass, row tile)
        in_specs=[
            # x: streamed in pass 0 only; pinned to block 0 in pass 1 (not read),
            # so it is not re-fetched from HBM during aggregation.
            pl.BlockSpec((tile_m, hidden), lambda p, i: (i * (1 - p), 0)),
            pl.BlockSpec((hidden, hidden), lambda p, i: (0, 0)),      # W_att
            pl.BlockSpec((1, hidden), lambda p, i: (0, 0)),           # a_att
            # v: needed in pass 1 only; pinned to block 0 in pass 0.
            pl.BlockSpec((tile_m, 1), lambda p, i: (i * p, 0)),
            pl.BlockSpec((hidden, OUT_PAD), lambda p, i: (0, 0)),     # W_combo (padded)
            pl.BlockSpec((1, OUT_PAD), lambda p, i: (0, 0)),          # b_combo (padded)
        ],
        out_specs=pl.BlockSpec((1, OUT_PAD), lambda p, i: (0, 0)),
        scratch_shapes=[
            pltpu.VMEM((1, 1), jnp.float32),               # running max of logits
            pltpu.VMEM((1, 1), jnp.float32),               # running softmax denominator
            pltpu.VMEM((1, hidden), jnp.float32),          # u = sum_i v_i * h1_i
            # Wh cache (f32 for accuracy; bf16 halves it for huge graphs on v7x).
            pltpu.VMEM((n_tiles, tile_m, hidden), jnp.float32),
        ],
    )

    out_padded = pl.pallas_call(
        functools.partial(_vuln_kernel, float(alpha), int(n_true), int(tile_m)),
        out_shape=jax.ShapeDtypeStruct((1, OUT_PAD), jnp.float32),
        grid_spec=grid_spec,
        compiler_params=pltpu.CompilerParams(
            # Both axes carry sequential state (online-softmax stats feed pass 1,
            # and the (1,H) accumulator is shared across row tiles).
            dimension_semantics=("arbitrary", "arbitrary")),
    )(x_pad, w_att, a_att, v_pad, w_combo_pad, b_combo_pad)

    return out_padded[:, :2]


def reference_forward(features, edge_index, params, *, alpha=0.2):
    """Pure-JAX f32 reference of the eval-mode forward (bf16-quantized MXU inputs)."""
    n, hidden = features.shape
    x = features.astype(jnp.bfloat16).astype(jnp.float32)
    w_att = params["w_att"].astype(jnp.bfloat16).astype(jnp.float32)

    wh = x @ w_att
    s = wh @ params["a_att"].reshape(hidden, 1)
    e = jnp.where(s > 0.0, s, alpha * s)
    att = jax.nn.softmax(e, axis=0)
    t = att * wh
    h1 = jnp.where(t > 0.0, t, jnp.exp(t) - 1.0)

    a_norm = _normalized_adjacency(edge_index, n)
    res = a_norm @ (h1 @ params["w_gcn"].astype(jnp.float32)) + params["b_gcn"][None, :]
    res = res @ params["w_out"].T.astype(jnp.float32) + params["b_out"][None, :]
    res = jnp.mean(res, axis=0, keepdims=True)
    return jax.nn.softmax(res, axis=-1)


if __name__ == "__main__":
    key = jax.random.PRNGKey(0)
    hidden = 128            # model hidden size (lane-aligned)
    num_nodes = 200         # graph nodes (padded to 256 inside the wrapper)
    num_edges = 400

    k_feat, k_src, k_dst, k_par = jax.random.split(key, 4)
    features = jax.random.normal(k_feat, (num_nodes, hidden), jnp.float32)
    src = jax.random.randint(k_src, (num_edges,), 0, num_nodes)
    dst = jax.random.randint(k_dst, (num_edges,), 0, num_nodes)
    edge_index = jnp.stack([jnp.concatenate([src, dst]),
                            jnp.concatenate([dst, src])]).astype(jnp.int32)

    ks = jax.random.split(k_par, 6)
    params = {
        "w_att": 0.1 * jax.random.normal(ks[0], (hidden, hidden), jnp.float32),
        "a_att": 0.1 * jax.random.normal(ks[1], (hidden,), jnp.float32),
        "w_gcn": 0.1 * jax.random.normal(ks[2], (hidden, hidden), jnp.float32),
        "b_gcn": 0.1 * jax.random.normal(ks[3], (hidden,), jnp.float32),
        "w_out": 0.1 * jax.random.normal(ks[4], (2, hidden), jnp.float32),
        "b_out": 0.1 * jax.random.normal(ks[5], (2,), jnp.float32),
    }

    out = vulnerability_detection_forward(features, edge_index, params,
                                          alpha=0.2, tile_m=256)
    out = jax.block_until_ready(out)

    ref = reference_forward(features, edge_index, params, alpha=0.2)
    assert out.shape == (1, 2), out.shape
    assert bool(jnp.allclose(out, ref, atol=5e-3, rtol=0.0)), (out, ref)
    assert bool(jnp.allclose(jnp.sum(out), 1.0, atol=1e-3)), out

    print("KERNEL_OK")
</pallas_src>

<mosaic_0001>
module attributes {stable_mosaic.version = 11 : i64} {
  func.func @_vuln_kernel(%arg0: i32, %arg1: i32, %arg2: memref<256x128xbf16, #tpu.memory_space<vmem>>, %arg3: memref<128x128xbf16, #tpu.memory_space<vmem>>, %arg4: memref<1x128xf32, #tpu.memory_space<vmem>>, %arg5: memref<256x1xf32, #tpu.memory_space<vmem>>, %arg6: memref<128x128xf32, #tpu.memory_space<vmem>>, %arg7: memref<1x128xf32, #tpu.memory_space<vmem>>, %arg8: memref<1x128xf32, #tpu.memory_space<vmem>>, %arg9: memref<1x1xf32, #tpu.memory_space<vmem>>, %arg10: memref<1x1xf32, #tpu.memory_space<vmem>>, %arg11: memref<1x128xf32, #tpu.memory_space<vmem>>, %arg12: memref<1x256x128xf32, #tpu.memory_space<vmem>>) attributes {dimension_semantics = [#tpu.dimension_semantics<arbitrary>, #tpu.dimension_semantics<arbitrary>], iteration_bounds = array<i64: 2, 1>, scalar_prefetch = 0 : i64, scratch_operands = 4 : i64, tpu.core_type = #tpu.core_type<tc>, window_params = [{transform_indices = @transform_0, window_bounds = array<i64: 256, 128>}, {pipeline_mode = #tpu.pipeline_mode<synchronous>, transform_indices = @transform_1, window_bounds = array<i64: 128, 128>}, {pipeline_mode = #tpu.pipeline_mode<synchronous>, transform_indices = @transform_2, window_bounds = array<i64: 1, 128>}, {transform_indices = @transform_3, window_bounds = array<i64: 256, 1>}, {pipeline_mode = #tpu.pipeline_mode<synchronous>, transform_indices = @transform_4, window_bounds = array<i64: 128, 128>}, {pipeline_mode = #tpu.pipeline_mode<synchronous>, transform_indices = @transform_5, window_bounds = array<i64: 1, 128>}, {pipeline_mode = #tpu.pipeline_mode<synchronous>, transform_indices = @transform_6, window_bounds = array<i64: 1, 128>}]} {
    %c0_i32 = arith.constant 0 : i32
    %0 = arith.cmpi eq, %arg0, %c0_i32 : i32
    %c0_i32_0 = arith.constant 0 : i32
    %1 = arith.cmpi eq, %arg1, %c0_i32_0 : i32
    %2 = arith.andi %0, %1 : i1
    %3 = arith.extui %2 : i1 to i32
    %c0_i32_1 = arith.constant 0 : i32
    %4 = arith.cmpi ne, %3, %c0_i32_1 : i32
    scf.if %4 {
      %cst = arith.constant -1.000000e+30 : f32
      %22 = vector.broadcast %cst : f32 to vector<1x1xf32>
      %c0 = arith.constant 0 : index
      %c0_8 = arith.constant 0 : index
      %23 = vector.load %arg9[%c0, %c0_8] : memref<1x1xf32, #tpu.memory_space<vmem>>, vector<1x1xf32>
      tpu.vector_store %arg9[%c0, %c0_8], %22 {strides = array<i32>} : memref<1x1xf32, #tpu.memory_space<vmem>>, vector<1x1xf32>,
      %cst_9 = arith.constant 0.000000e+00 : f32
      %24 = vector.broadcast %cst_9 : f32 to vector<1x1xf32>
      %c0_10 = arith.constant 0 : index
      %c0_11 = arith.constant 0 : index
      %25 = vector.load %arg10[%c0_10, %c0_11] : memref<1x1xf32, #tpu.memory_space<vmem>>, vector<1x1xf32>
      tpu.vector_store %arg10[%c0_10, %c0_11], %24 {strides = array<i32>} : memref<1x1xf32, #tpu.memory_space<vmem>>, vector<1x1xf32>,
      %cst_12 = arith.constant 0.000000e+00 : f32
      %26 = vector.broadcast %cst_12 : f32 to vector<1x128xf32>
      %c0_13 = arith.constant 0 : index
      %c0_14 = arith.constant 0 : index
      %27 = vector.load %arg11[%c0_13, %c0_14] : memref<1x128xf32, #tpu.memory_space<vmem>>, vector<1x128xf32>
      tpu.vector_store %arg11[%c0_13, %c0_14], %26 {strides = array<i32>} : memref<1x128xf32, #tpu.memory_space<vmem>>, vector<1x128xf32>,
    } else {
    }
    %c256_i32 = arith.constant 256 : i32
    %5 = arith.muli %arg1, %c256_i32 : i32
    %6 = tpu.iota {dimensions = array<i32: 0>} : vector<256x1xi32>
    %7 = vector.broadcast %5 : i32 to vector<256x1xi32>
    %8 = arith.addi %7, %6 : vector<256x1xi32>
    %c200_i32 = arith.constant 200 : i32
    %9 = vector.broadcast %c200_i32 : i32 to vector<256x1xi32>
    %10 = arith.cmpi slt, %8, %9 : vector<256x1xi32>
    %c0_i32_2 = arith.constant 0 : i32
    %11 = arith.cmpi eq, %arg0, %c0_i32_2 : i32
    %12 = arith.extui %11 : i1 to i32
    %c0_i32_3 = arith.constant 0 : i32
    %13 = arith.cmpi ne, %12, %c0_i32_3 : i32
    scf.if %13 {
      %c0 = arith.constant 0 : index
      %c0_8 = arith.constant 0 : index
      %22 = vector.load %arg2[%c0, %c0_8] : memref<256x128xbf16, #tpu.memory_space<vmem>>, vector<256x128xbf16>
      %c0_9 = arith.constant 0 : index
      %c0_10 = arith.constant 0 : index
      %23 = vector.load %arg3[%c0_9, %c0_10] : memref<128x128xbf16, #tpu.memory_space<vmem>>, vector<128x128xbf16>
      %cst = arith.constant dense<0.000000e+00> : vector<256x128xf32>
      %24 = tpu.matmul %22, %23, %cst {dimension_numbers = #tpu.dot_dimension_numbers<[1], [0], [0], [1], [0, 0, 1, 1], [], []>} : vector<256x128xbf16>, vector<128x128xbf16>, vector<256x128xf32> -> vector<256x128xf32>
      %25 = arith.index_cast %arg1 : i32 to index
      %c0_11 = arith.constant 0 : index
      %c0_12 = arith.constant 0 : index
      %26 = vector.load %arg12[%25, %c0_11, %c0_12] : memref<1x256x128xf32, #tpu.memory_space<vmem>>, vector<1x256x128xf32>
      %27 = vector.shape_cast %26 : vector<1x256x128xf32> to vector<256x128xf32>
      %28 = vector.shape_cast %24 : vector<256x128xf32> to vector<1x256x128xf32>
      tpu.vector_store %arg12[%25, %c0_11, %c0_12], %28 {strides = array<i32>} : memref<1x256x128xf32, #tpu.memory_space<vmem>>, vector<1x256x128xf32>,
      %c0_13 = arith.constant 0 : index
      %c0_14 = arith.constant 0 : index
      %29 = vector.load %arg4[%c0_13, %c0_14] : memref<1x128xf32, #tpu.memory_space<vmem>>, vector<1x128xf32>
      %30 = vector.broadcast %29 : vector<1x128xf32> to vector<256x128xf32>
      %31 = arith.mulf %24, %30 : vector<256x128xf32>
      %cst_15 = arith.constant dense<0.000000e+00> : vector<256xf32>
      %32 = vector.multi_reduction <add>, %31, %cst_15 [1] : vector<256x128xf32> to vector<256xf32>
      %33 = vector.shape_cast %32 : vector<256xf32> to vector<256x1xf32>
      %cst_16 = arith.constant 0.000000e+00 : f32
      %34 = vector.broadcast %cst_16 : f32 to vector<256x1xf32>
      %35 = arith.cmpf ogt, %33, %34 : vector<256x1xf32>
      %cst_17 = arith.constant 2.000000e-01 : f32
      %36 = vector.broadcast %cst_17 : f32 to vector<256x1xf32>
      %37 = arith.mulf %36, %33 : vector<256x1xf32>
      %38 = arith.select %35, %33, %37 : vector<256x1xi1>, vector<256x1xf32>
      %cst_18 = arith.constant -1.000000e+30 : f32
      %39 = vector.broadcast %cst_18 : f32 to vector<256x1xf32>
      %40 = arith.select %10, %38, %39 : vector<256x1xi1>, vector<256x1xf32>
      %c0_19 = arith.constant 0 : index
      %c0_20 = arith.constant 0 : index
      %41 = vector.load %arg9[%c0_19, %c0_20] : memref<1x1xf32, #tpu.memory_space<vmem>>, vector<1x1xf32>
      %cst_21 = arith.constant dense<0xFF800000> : vector<1xf32>
      %42 = vector.multi_reduction <maximumf>, %40, %cst_21 [0] : vector<256x1xf32> to vector<1xf32>
      %43 = vector.shape_cast %42 : vector<1xf32> to vector<1x1xf32>
      %44 = arith.maximumf %41, %43 : vector<1x1xf32>
      %c0_22 = arith.constant 0 : index
      %c0_23 = arith.constant 0 : index
      %45 = vector.load %arg10[%c0_22, %c0_23] : memref<1x1xf32, #tpu.memory_space<vmem>>, vector<1x1xf32>
      %46 = arith.subf %41, %44 : vector<1x1xf32>
      %47 = math.exp %46 : vector<1x1xf32>
      %48 = arith.mulf %45, %47 : vector<1x1xf32>
      %49 = vector.broadcast %44 : vector<1x1xf32> to vector<256x1xf32>
      %50 = arith.subf %40, %49 : vector<256x1xf32>
      %51 = math.exp %50 : vector<256x1xf32>
      %cst_24 = arith.constant dense<0.000000e+00> : vector<1xf32>
      %52 = vector.multi_reduction <add>, %51, %cst_24 [0] : vector<256x1xf32> to vector<1xf32>
      %53 = vector.shape_cast %52 : vector<1xf32> to vector<1x1xf32>
      %54 = arith.addf %48, %53 : vector<1x1xf32>
      %c0_25 = arith.constant 0 : index
      %c0_26 = arith.constant 0 : index
      %55 = vector.load %arg10[%c0_25, %c0_26] : memref<1x1xf32, #tpu.memory_space<vmem>>, vector<1x1xf32>
      tpu.vector_store %arg10[%c0_25, %c0_26], %54 {strides = array<i32>} : memref<1x1xf32, #tpu.memory_space<vmem>>, vector<1x1xf32>,
      %c0_27 = arith.constant 0 : index
      %c0_28 = arith.constant 0 : index
      %56 = vector.load %arg9[%c0_27, %c0_28] : memref<1x1xf32, #tpu.memory_space<vmem>>, vector<1x1xf32>
      tpu.vector_store %arg9[%c0_27, %c0_28], %44 {strides = array<i32>} : memref<1x1xf32, #tpu.memory_space<vmem>>, vector<1x1xf32>,
    } else {
    }
    %c1_i32 = arith.constant 1 : i32
    %14 = arith.cmpi eq, %arg0, %c1_i32 : i32
    %15 = arith.extui %14 : i1 to i32
    %c0_i32_4 = arith.constant 0 : i32
    %16 = arith.cmpi ne, %15, %c0_i32_4 : i32
    scf.if %16 {
      %22 = arith.index_cast %arg1 : i32 to index
      %c0 = arith.constant 0 : index
      %c0_8 = arith.constant 0 : index
      %23 = vector.load %arg12[%22, %c0, %c0_8] : memref<1x256x128xf32, #tpu.memory_space<vmem>>, vector<1x256x128xf32>
      %24 = vector.shape_cast %23 : vector<1x256x128xf32> to vector<256x128xf32>
      %c0_9 = arith.constant 0 : index
      %c0_10 = arith.constant 0 : index
      %25 = vector.load %arg4[%c0_9, %c0_10] : memref<1x128xf32, #tpu.memory_space<vmem>>, vector<1x128xf32>
      %26 = vector.broadcast %25 : vector<1x128xf32> to vector<256x128xf32>
      %27 = arith.mulf %24, %26 : vector<256x128xf32>
      %cst = arith.constant dense<0.000000e+00> : vector<256xf32>
      %28 = vector.multi_reduction <add>, %27, %cst [1] : vector<256x128xf32> to vector<256xf32>
      %29 = vector.shape_cast %28 : vector<256xf32> to vector<256x1xf32>
      %cst_11 = arith.constant 0.000000e+00 : f32
      %30 = vector.broadcast %cst_11 : f32 to vector<256x1xf32>
      %31 = arith.cmpf ogt, %29, %30 : vector<256x1xf32>
      %cst_12 = arith.constant 2.000000e-01 : f32
      %32 = vector.broadcast %cst_12 : f32 to vector<256x1xf32>
      %33 = arith.mulf %32, %29 : vector<256x1xf32>
      %34 = arith.select %31, %29, %33 : vector<256x1xi1>, vector<256x1xf32>
      %cst_13 = arith.constant -1.000000e+30 : f32
      %35 = vector.broadcast %cst_13 : f32 to vector<256x1xf32>
      %36 = arith.select %10, %34, %35 : vector<256x1xi1>, vector<256x1xf32>
      %c0_14 = arith.constant 0 : index
      %c0_15 = arith.constant 0 : index
      %37 = vector.load %arg9[%c0_14, %c0_15] : memref<1x1xf32, #tpu.memory_space<vmem>>, vector<1x1xf32>
      %38 = vector.broadcast %37 : vector<1x1xf32> to vector<256x1xf32>
      %39 = arith.subf %36, %38 : vector<256x1xf32>
      %40 = math.exp %39 : vector<256x1xf32>
      %c0_16 = arith.constant 0 : index
      %c0_17 = arith.constant 0 : index
      %41 = vector.load %arg10[%c0_16, %c0_17] : memref<1x1xf32, #tpu.memory_space<vmem>>, vector<1x1xf32>
      %42 = tpu.reciprocal %41 {approx = true} : vector<1x1xf32> -> vector<1x1xf32>
      %43 = vector.broadcast %42 : vector<1x1xf32> to vector<256x1xf32>
      %44 = arith.mulf %40, %43 : vector<256x1xf32>
      %45 = vector.broadcast %44 : vector<256x1xf32> to vector<256x128xf32>
      %46 = arith.mulf %45, %24 : vector<256x128xf32>
      %cst_18 = arith.constant 0.000000e+00 : f32
      %47 = vector.broadcast %cst_18 : f32 to vector<256x128xf32>
      %48 = arith.cmpf ogt, %46, %47 : vector<256x128xf32>
      %49 = math.exp %46 : vector<256x128xf32>
      %cst_19 = arith.constant 1.000000e+00 : f32
      %50 = vector.broadcast %cst_19 : f32 to vector<256x128xf32>
      %51 = arith.subf %49, %50 : vector<256x128xf32>
      %52 = arith.select %48, %46, %51 : vector<256x128xi1>, vector<256x128xf32>
      %c0_20 = arith.constant 0 : index
      %c0_21 = arith.constant 0 : index
      %53 = vector.load %arg11[%c0_20, %c0_21] : memref<1x128xf32, #tpu.memory_space<vmem>>, vector<1x128xf32>
      %c0_22 = arith.constant 0 : index
      %c0_23 = arith.constant 0 : index
      %54 = vector.load %arg5[%c0_22, %c0_23] : memref<256x1xf32, #tpu.memory_space<vmem>>, vector<256x1xf32>
      %55 = vector.broadcast %54 : vector<256x1xf32> to vector<256x128xf32>
      %56 = arith.mulf %55, %52 : vector<256x128xf32>
      %cst_24 = arith.constant dense<0.000000e+00> : vector<128xf32>
      %57 = vector.multi_reduction <add>, %56, %cst_24 [0] : vector<256x128xf32> to vector<128xf32>
      %58 = vector.shape_cast %57 : vector<128xf32> to vector<1x128xf32>
      %59 = arith.addf %53, %58 : vector<1x128xf32>
      %c0_25 = arith.constant 0 : index
      %c0_26 = arith.constant 0 : index
      %60 = vector.load %arg11[%c0_25, %c0_26] : memref<1x128xf32, #tpu.memory_space<vmem>>, vector<1x128xf32>
      tpu.vector_store %arg11[%c0_25, %c0_26], %59 {strides = array<i32>} : memref<1x128xf32, #tpu.memory_space<vmem>>, vector<1x128xf32>,
    } else {
    }
    %c1_i32_5 = arith.constant 1 : i32
    %17 = arith.cmpi eq, %arg0, %c1_i32_5 : i32
    %c0_i32_6 = arith.constant 0 : i32
    %18 = arith.cmpi eq, %arg1, %c0_i32_6 : i32
    %19 = arith.andi %17, %18 : i1
    %20 = arith.extui %19 : i1 to i32
    %c0_i32_7 = arith.constant 0 : i32
    %21 = arith.cmpi ne, %20, %c0_i32_7 : i32
    scf.if %21 {
      %c0 = arith.constant 0 : index
      %c0_8 = arith.constant 0 : index
      %22 = vector.load %arg11[%c0, %c0_8] : memref<1x128xf32, #tpu.memory_space<vmem>>, vector<1x128xf32>
      %c0_9 = arith.constant 0 : index
      %c0_10 = arith.constant 0 : index
      %23 = vector.load %arg6[%c0_9, %c0_10] : memref<128x128xf32, #tpu.memory_space<vmem>>, vector<128x128xf32>
      %cst = arith.constant dense<0.000000e+00> : vector<1x128xf32>
      %24 = tpu.matmul %22, %23, %cst {dimension_numbers = #tpu.dot_dimension_numbers<[1], [0], [0], [1], [0, 0, 1, 1], [], []>} : vector<1x128xf32>, vector<128x128xf32>, vector<1x128xf32> -> vector<1x128xf32>
      %c0_11 = arith.constant 0 : index
      %c0_12 = arith.constant 0 : index
      %25 = vector.load %arg7[%c0_11, %c0_12] : memref<1x128xf32, #tpu.memory_space<vmem>>, vector<1x128xf32>
      %26 = arith.addf %24, %25 : vector<1x128xf32>
      %cst_13 = arith.constant dense<0xFF800000> : vector<1xf32>
      %27 = vector.multi_reduction <maximumf>, %26, %cst_13 [1] : vector<1x128xf32> to vector<1xf32>
      %28 = vector.shape_cast %27 : vector<1xf32> to vector<1x1xf32>
      %29 = vector.broadcast %28 : vector<1x1xf32> to vector<1x128xf32>
      %30 = arith.subf %26, %29 : vector<1x128xf32>
      %31 = math.exp %30 : vector<1x128xf32>
      %cst_14 = arith.constant dense<0.000000e+00> : vector<1xf32>
      %32 = vector.multi_reduction <add>, %31, %cst_14 [1] : vector<1x128xf32> to vector<1xf32>
      %33 = vector.shape_cast %32 : vector<1xf32> to vector<1x1xf32>
      %34 = vector.broadcast %33 : vector<1x1xf32> to vector<1x128xf32>
      %35 = arith.divf %31, %34 : vector<1x128xf32>
      %c0_15 = arith.constant 0 : index
      %c0_16 = arith.constant 0 : index
      %36 = vector.load %arg8[%c0_15, %c0_16] : memref<1x128xf32, #tpu.memory_space<vmem>>, vector<1x128xf32>
      tpu.vector_store %arg8[%c0_15, %c0_16], %35 {strides = array<i32>} : memref<1x128xf32, #tpu.memory_space<vmem>>, vector<1x128xf32>,
    } else {
    }
    return
  }
  func.func @transform_0(%arg0: i32, %arg1: i32) -> (i32, i32) {
    %c1_i32 = arith.constant 1 : i32
    %0 = arith.subi %c1_i32, %arg0 : i32
    %1 = arith.muli %arg1, %0 : i32
    %c0_i32 = arith.constant 0 : i32
    %c0_i32_0 = arith.constant 0 : i32
    return %1, %c0_i32 : i32, i32
  }
  func.func @transform_1(%arg0: i32, %arg1: i32) -> (i32, i32) {
    %c0_i32 = arith.constant 0 : i32
    %c0_i32_0 = arith.constant 0 : i32
    %c0_i32_1 = arith.constant 0 : i32
    return %c0_i32, %c0_i32_0 : i32, i32
  }
  func.func @transform_2(%arg0: i32, %arg1: i32) -> (i32, i32) {
    %c0_i32 = arith.constant 0 : i32
    %c0_i32_0 = arith.constant 0 : i32
    %c0_i32_1 = arith.constant 0 : i32
    return %c0_i32, %c0_i32_0 : i32, i32
  }
  func.func @transform_3(%arg0: i32, %arg1: i32) -> (i32, i32) {
    %0 = arith.muli %arg1, %arg0 : i32
    %c0_i32 = arith.constant 0 : i32
    %c0_i32_0 = arith.constant 0 : i32
    return %0, %c0_i32 : i32, i32
  }
  func.func @transform_4(%arg0: i32, %arg1: i32) -> (i32, i32) {
    %c0_i32 = arith.constant 0 : i32
    %c0_i32_0 = arith.constant 0 : i32
    %c0_i32_1 = arith.constant 0 : i32
    return %c0_i32, %c0_i32_0 : i32, i32
  }
  func.func @transform_5(%arg0: i32, %arg1: i32) -> (i32, i32) {
    %c0_i32 = arith.constant 0 : i32
    %c0_i32_0 = arith.constant 0 : i32
    %c0_i32_1 = arith.constant 0 : i32
    return %c0_i32, %c0_i32_0 : i32, i32
  }
  func.func @transform_6(%arg0: i32, %arg1: i32) -> (i32, i32) {
    %c0_i32 = arith.constant 0 : i32
    %c0_i32_0 = arith.constant 0 : i32
    %c0_i32_1 = arith.constant 0 : i32
    return %c0_i32, %c0_i32_0 : i32, i32
  }
}

</mosaic_0001>

<bundles_post_ra>
// kernel: tpu_custom_call.1
= control target key start
LH: loop header
LB: loop body
LE: loop exit
PB: predicated region body
PF: predicated region fallthrough
CT: control target
= control target key end

     0   :  { %11 = vsyncpa [#allocation7], 0  ;;  %s4053_s0 = inlined_call_operand.vmem [shape: bf16[256,128], index: 0, kind: input, shape index: {}]   ;;  %s4054_s1 = inlined_call_operand.hbm [shape: bf16[128,128], index: 1, kind: input, shape index: {}]   ;;  %s4055_s2 = inlined_call_operand.vmem [shape: f32[1,128], index: 2, kind: input, shape index: {}]   ;;  %s4056_s3 = inlined_call_operand.vmem [shape: f32[256,1], index: 3, kind: input, shape index: {}]   ;;  %s4057_s4 = inlined_call_operand.vmem [shape: f32[128,128], index: 4, kind: input, shape index: {}]   ;;  %s4058_s5 = inlined_call_operand.vmem [shape: f32[1,128], index: 5, kind: input, shape index: {}]   ;;  %s4059_s6 = inlined_call_operand.hbm [shape: f32[1,128], index: 6, kind: output, shape index: {}]  }
   0x1   :  { %12 = vsyncpa [#allocation8], 0  ;;  %s3105_s21 = smov 0   ;;  %s3107_s22 = smov 0  }
   0x2   :  { %s3109_s23 = smov 0  }
   0x3 LB: > { %s2475_s24 = sadd.s32 4294967295, %s3058_s23   ;;  %s30_s25 = sadd.s32 1, %s3054_s22  ;;  %s3058_s23 = sphi %s3109_s23, %s18_s23   ;;  %s3054_s22 = sphi %s3107_s22, %s4070_s22   ;;  %s3050_s21 = sphi %s3105_s21, %s4069_s21  }
   0x4   : > { %p32_p0 = scmp.ge.s32.totalorder %s30_s25, 2  ;;  %p2476_p1 = scmp.ge.s32.totalorder %s3058_s23, 1 }
   0x5   : > { %p198_p2 = scmp.lt.s32.totalorder %s3058_s23, 3  ;;  %p3132_p4 = scmp.eq.s32.totalorder %s2475_s24, 0 }
   0x6   : > { %s4072_s25 = smov (%p32_p0, %s30_s25), 0  ;;  %s3060_s28 = smov [#allocation6]  }
   0x7   : > { %p3126_p3 = pnand %p2476_p1, %p198_p2  ;;  %s210_s29 = sshll.u32 %s3060_s28, 4  ;;  %s211_s29 = int_to_ptr.vmem [resolvable:$true] %s210_s29 }
   0x8   : > { %s4064_s27 = scalar_select %p3132_p4, 1, 0 }
   0x9   : > { %s4063_s26 = scalar_select %p3126_p3, 1, 0 }
   0xa   : > { %p2724_p5 = pneg %p3126_p3  ;;  %s2974_s9 = scalar_lea.hbm %s4054_s1, 1024 }
   0xb   : > { %p2975_p7 = scmp.ne.s32.totalorder %s4054_s1, %s2974_s9  ;;  %p2981_p11 = scmp.lt.u32.totalorder %s2974_s9, %s4054_s1 }
   0xc   : > { %p3140_p6 = pnand %p3132_p4, %p2724_p5 }
   0xe   : > { %p2976_p8 = pneg %p3140_p6 }
  0x10   : > { %p2977_p9 = pnand %p2976_p8, %p2975_p7 }
  0x12   : > { %p2978_p10 = pneg %p2977_p9 }
  0x14   : > { %p2983_p12 = pnand %p2981_p11, %p2978_p10 }
  0x16   : > { %2986 = shalt.err (!%p2983_p12)
}
  0x17   : > { %s2987_s14 = scalar_lea.vmem %s211_s29, 1024  ;;  %p2995_p2 = scmp.lt.s32.totalorder %s211_s29, %s211_s29 }
  0x18   : > { %p2988_p13 = scmp.ne.s32.totalorder %s211_s29, %s2987_s14  ;;  %p2996_p5 = scmp.lt.s32.totalorder %s2987_s14, %s2987_s14 }
  0x1a   : > { %p2990_p0 = pnand %p2988_p13, %p2976_p8  ;;  %p2997_p4 = por %p2996_p5, %p2995_p2 }
  0x1c   : > { %p2991_p1 = pneg %p2990_p0 }
  0x1e   : > { %p2998_p3 = pnand %p2997_p4, %p2991_p1 }
  0x20   : > { %3001 = shalt.err (!%p2998_p3)
}
  0x21   : > { %s3061_s15 = smov 64   ;;  %s3062_s16 = smov 4  }
  0x22   : > { %2727 = dma.hbm_to_vmem [thread:$0]  (!%p3140_p6), %s4054_s1, 1024, %s211_s29, [#allocation7], %s3061_s15, %s3061_s15, %s3062_s16  }
  0x23   : > { %p4066_p7 = scmp.ne.s32.totalorder %s4063_s26, 0 }
  0x24   : > { %p4067_p9 = scmp.ne.s32.totalorder (!%p4066_p7), %s4064_s27, 0 }
  0x25   : > { %259 = sbr.rel (%p4066_p7) target bundleno = 1618 (0x652), region = 44 }
  0x2c   : > { %3041 = dma.done.wait (%p4067_p9), [#allocation7], 1024  }
  0x2d   : > { %3043 = vsyncadd (%p4067_p9), [#allocation7], 4294966272  ;;  %p311_p4 = scmp.eq.s32.totalorder %s3050_s21, 0 }
  0x2e   : > { %vm317_vm0 = vcmask (%p311_p4), 0   ;;  %v3063_v0 = vmov (%p311_p4), -1e+30   ;;  %v3064_v1 = vmov (%p311_p4), 0.0  }
  0x2f   : > { %316 = sbr.rel (!%p311_p4) target bundleno = 54 (0x36), region = 52  ;;  %318 = vst.msk [vmem:[#allocation2] sm:$0x1] (%p311_p4), %vm317_vm0, %v3063_v0  ;;  %319 = vst.msk [vmem:[#allocation3] sm:$0x1] (%p311_p4), %vm317_vm0, %v3064_v1 }
  0x30   : > { %320 = vst [vmem:[#allocation4] sm:$0x1] (%p311_p4), %v3064_v1 }
  0x36 PF: > { %p2484_p3 = scmp.ne.s32.totalorder %s3050_s21, 0 }
  0x37   : > { %v2766_v2 = vld [vmem:[#allocation6] sm:$0xff] (!%p2484_p3)   ;;  %v2767_v3 = vld [vmem:[#allocation6 + $0x8] sm:$0xff] (!%p2484_p3)   ;;  %v2768_v4 = vld [vmem:[#allocation6 + $0x10] sm:$0xff] (!%p2484_p3)  }
  0x38   : > { %422 = sbr.rel (%p2484_p3) target bundleno = 613 (0x265), region = 56  ;;  %2593 = vmatprep.subr.bf16.mxu0 (!%p2484_p3), %v2766_v2  ;;  %2700 = vmatprep.subr.bf16.mxu1 (!%p2484_p3), %v2766_v2  ;;  %v2769_v5 = vld [vmem:[#allocation6 + $0x18] sm:$0xff] (!%p2484_p3)   ;;  %v2770_v8 = vld [vmem:[#allocation6 + $0x20] sm:$0xff] (!%p2484_p3)   ;;  %v2771_v9 = vld [vmem:[#allocation6 + $0x28] sm:$0xff] (!%p2484_p3)  }
  0x39   : > { %2594 = vmatpush3.bf16.msra.mxu0 (!%p2484_p3), %v2766_v2  ;;  %2708 = vmatpush3.bf16.msra.mxu1 (!%p2484_p3), %v2766_v2  ;;  %v2774_v6 = vld [vmem:[%s4053_s0] sm:$0xff] (!%p2484_p3)   ;;  %v2772_v10 = vld [vmem:[#allocation6 + $0x30] sm:$0xff] (!%p2484_p3)   ;;  %v2776_v12 = vld [vmem:[%s4053_s0 + $0x8] sm:$0xff] (!%p2484_p3)  }
  0x3a   : > { %2595 = vmatprep.subr.bf16.mxu0 (!%p2484_p3), %v2767_v3  ;;  %2701 = vmatprep.subr.bf16.mxu1 (!%p2484_p3), %v2767_v3  ;;  %v2775_v7 = vld [vmem:[%s4053_s0 + $0x40] sm:$0xff] (!%p2484_p3)   ;;  %v2777_v13 = vld [vmem:[%s4053_s0 + $0x48] sm:$0xff] (!%p2484_p3)   ;;  %v2778_v14 = vld [vmem:[%s4053_s0 + $0x10] sm:$0xff] (!%p2484_p3)  }
  0x3b   : > { %2609 = vmatprep.mubr.bf16.mxu0 (!%p2484_p3), %v2774_v6  ;;  %2625 = vmatprep.mubr.bf16.mxu1 (!%p2484_p3), %v2775_v7  ;;  %v2773_v11 = vld [vmem:[#allocation6 + $0x38] sm:$0xff] (!%p2484_p3)   ;;  %v2780_v15 = vld [vmem:[%s4053_s0 + $0x50] sm:$0xff] (!%p2484_p3)   ;;  %v2783_v20 = vld [vmem:[%s4053_s0 + $0x28] sm:$0xff] (!%p2484_p3)  }
  0x3c   : > { %v2779_v16 = vld [vmem:[%s4053_s0 + $0x18] sm:$0xff] (!%p2484_p3)   ;;  %v2782_v18 = vld [vmem:[%s4053_s0 + $0x20] sm:$0xff] (!%p2484_p3)   ;;  %v2787_v21 = vld [vmem:[%s4053_s0 + $0x68] sm:$0xff] (!%p2484_p3)  }
  0x3d   : > { %2596 = vmatpush3.bf16.msra.mxu0 (!%p2484_p3), %v2767_v3  ;;  %2709 = vmatpush3.bf16.msra.mxu1 (!%p2484_p3), %v2767_v3  ;;  %v2781_v17 = vld [vmem:[%s4053_s0 + $0x58] sm:$0xff] (!%p2484_p3)   ;;  %v2786_v19 = vld [vmem:[%s4053_s0 + $0x60] sm:$0xff] (!%p2484_p3)   ;;  %v2784_v22 = vld [vmem:[%s4053_s0 + $0x30] sm:$0xff] (!%p2484_p3)  }
  0x3e   : > { %2597 = vmatprep.subr.bf16.mxu0 (!%p2484_p3), %v2768_v4  ;;  %2702 = vmatprep.subr.bf16.mxu1 (!%p2484_p3), %v2768_v4  ;;  %v2785_v23 = vld [vmem:[%s4053_s0 + $0x38] sm:$0xff] (!%p2484_p3)   ;;  %v2788_v24 = vld [vmem:[%s4053_s0 + $0x70] sm:$0xff] (!%p2484_p3)   ;;  %v3219_v26 = vld [vmem:[%s4055_s2] ss:$0 sm:$0xff] (!%p2484_p3) }
  0x3f   : > { %v2789_v25 = vld [vmem:[%s4053_s0 + $0x78] sm:$0xff]  }
  0x41   : > { %2598 = vmatpush3.bf16.msra.mxu0 %v2768_v4  ;;  %2710 = vmatpush3.bf16.msra.mxu1 %v2768_v4 }
  0x42   : > { %2599 = vmatprep.subr.bf16.mxu0 %v2769_v5  ;;  %2703 = vmatprep.subr.bf16.mxu1 %v2769_v5 }
  0x45   : > { %2600 = vmatpush3.bf16.msra.mxu0 %v2769_v5  ;;  %2711 = vmatpush3.bf16.msra.mxu1 %v2769_v5 }
  0x46   : > { %2601 = vmatprep.subr.bf16.mxu0 %v2770_v8  ;;  %2704 = vmatprep.subr.bf16.mxu1 %v2770_v8 }
  0x49   : > { %2602 = vmatpush3.bf16.msra.mxu0 %v2770_v8  ;;  %2712 = vmatpush3.bf16.msra.mxu1 %v2770_v8 }
  0x4a   : > { %2603 = vmatprep.subr.bf16.mxu0 %v2771_v9  ;;  %2705 = vmatprep.subr.bf16.mxu1 %v2771_v9 }
  0x4d   : > { %2604 = vmatpush3.bf16.msra.mxu0 %v2771_v9  ;;  %2713 = vmatpush3.bf16.msra.mxu1 %v2771_v9 }
  0x4e   : > { %2605 = vmatprep.subr.bf16.mxu0 %v2772_v10  ;;  %2706 = vmatprep.subr.bf16.mxu1 %v2772_v10 }
  0x51   : > { %2606 = vmatpush3.bf16.msra.mxu0 %v2772_v10  ;;  %2714 = vmatpush3.bf16.msra.mxu1 %v2772_v10 }
  0x52   : > { %2607 = vmatprep.subr.bf16.mxu0 %v2773_v11  ;;  %2707 = vmatprep.subr.bf16.mxu1 %v2773_v11 }
  0x55   : > { %2608 = vmatpush3.bf16.msra.mxu0 %v2773_v11  ;;  %2715 = vmatpush3.bf16.msra.mxu1 %v2773_v11 }
  0x58   : > { %2610 = vmatmul.mubr.bf16.vlgmr.msra.gmra.mrb[0].mxu0 %v2776_v12  ;;  %2626 = vmatmul.mubr.bf16.vlgmr.msra.gmra.mrb[0].mxu1 %v2777_v13 }
  0x59   : > { %2613 = vmatprep.mubr.bf16.mxu0 %v2778_v14  ;;  %2629 = vmatprep.mubr.bf16.mxu1 %v2780_v15 }
  0x60   : > { %2614 = vmatmul.mubr.bf16.gmra.mrb[4].mxu0 %v2779_v16  ;;  %2630 = vmatmul.mubr.bf16.gmra.mrb[4].mxu1 %v2781_v17 }
  0x61   : > { %2617 = vmatprep.mubr.bf16.mxu0 %v2782_v18  ;;  %2633 = vmatprep.mubr.bf16.mxu1 %v2786_v19 }
  0x68   : > { %2618 = vmatmul.mubr.bf16.gmra.mrb[8].mxu0 %v2783_v20  ;;  %2634 = vmatmul.mubr.bf16.gmra.mrb[8].mxu1 %v2787_v21 }
  0x69   : > { %2621 = vmatprep.mubr.bf16.mxu0 %v2784_v22  ;;  %2637 = vmatprep.mubr.bf16.mxu1 %v2788_v24 }
  0x70   : > { %2622 = vmatmul.mubr.bf16.gmra.mrb[12].mxu0 %v2785_v23  ;;  %2638 = vmatmul.mubr.bf16.gmra.mrb[12].mxu1 %v2789_v25 }
 0x12b   : > { %v2611_v27 = vpop.f32.mrb[0].mxu0  ;;  %v2627_v28 = vpop.f32.mrb[0].mxu1 }
 0x12c   : > { %779 = vst [vmem:[#allocation5 + $0x10] sm:$0xff] %v2611_v27  ;;  %795 = vst [vmem:[#allocation5 + $0x90] sm:$0xff] %v2627_v28  ;;  %v649_v29 = vpop.f32.mrb[1].mxu0  ;;  %v713_v30 = vpop.f32.mrb[1].mxu1  ;;  %v834_v31 = vmul.f32 %v2627_v28, %v3219_v26  ;;  %v818_v32 = vmul.f32 %v2611_v27, %v3219_v26 }
 0x12d   : > { %777 = vst [vmem:[#allocation5] sm:$0xff] %v649_v29  ;;  %793 = vst [vmem:[#allocation5 + $0x80] sm:$0xff] %v713_v30  ;;  %v2612_v33 = vpop.f32.mrb[2].mxu0  ;;  %v2628_v34 = vpop.f32.mrb[2].mxu1  ;;  %v816_v37 = vmul.f32 %v3219_v26, %v649_v29  ;;  %v832_v41 = vmul.f32 %v3219_v26, %v713_v30 }
 0x12e   : > { %780 = vst [vmem:[#allocation5 + $0x18] sm:$0xff] %v2612_v33  ;;  %796 = vst [vmem:[#allocation5 + $0x98] sm:$0xff] %v2628_v34  ;;  %884 = vadd.xlane.f32.xlu0 %v834_v31  ;;  %v716_v35 = vpop.f32.mrb[3].mxu1  ;;  %852 = vadd.xlane.f32.xlu1 %v818_v32  ;;  %v652_v36 = vpop.f32.mrb[3].mxu0  ;;  %v819_v38 = vmul.f32 %v2612_v33, %v3219_v26  ;;  %v835_v42 = vmul.f32 %v2628_v34, %v3219_v26 }
 0x12f   : > { %794 = vst [vmem:[#allocation5 + $0x88] sm:$0xff] %v716_v35  ;;  %778 = vst [vmem:[#allocation5 + $0x8] sm:$0xff] %v652_v36  ;;  %v833_v49 = vmul.f32 %v3219_v26, %v716_v35  ;;  %v817_v50 = vmul.f32 %v3219_v26, %v652_v36 }
 0x132   : > { %848 = vadd.xlane.f32.xlu0 %v816_v37  ;;  %854 = vadd.xlane.f32.xlu1 %v819_v38 }
 0x133   : > { %v2615_v39 = vpop.f32.mrb[4].mxu0  ;;  %v3225_v40 = vpop.f32.mrb[4].mxu1 }
 0x134   : > { %783 = vst [vmem:[#allocation5 + $0x30] sm:$0xff] %v2615_v39  ;;  %v665_v43 = vpop.f32.mrb[5].mxu0  ;;  %799 = vst [vmem:[#allocation5 + $0xb0] sm:$0xff] %v3225_v40  ;;  %v729_v44 = vpop.f32.mrb[5].mxu1  ;;  %v822_v51 = vmul.f32 %v2615_v39, %v3219_v26  ;;  %v838_v13 = vmul.f32 %v3225_v40, %v3219_v26 }
 0x135   : > { %781 = vst [vmem:[#allocation5 + $0x20] sm:$0xff] %v665_v43  ;;  %v2616_v45 = vpop.f32.mrb[6].mxu0  ;;  %797 = vst [vmem:[#allocation5 + $0xa0] sm:$0xff] %v729_v44  ;;  %v3230_v46 = vpop.f32.mrb[6].mxu1  ;;  %v820_v61 = vmul.f32 %v3219_v26, %v665_v43  ;;  %v836_v63 = vmul.f32 %v3219_v26, %v729_v44 }
 0x136   : > { %880 = vadd.xlane.f32.xlu0 %v832_v41  ;;  %886 = vadd.xlane.f32.xlu1 %v835_v42  ;;  %784 = vst [vmem:[#allocation5 + $0x38] sm:$0xff] %v2616_v45  ;;  %v668_v47 = vpop.f32.mrb[7].mxu0  ;;  %800 = vst [vmem:[#allocation5 + $0xb8] sm:$0xff] %v3230_v46  ;;  %v732_v48 = vpop.f32.mrb[7].mxu1  ;;  %v823_v52 = vmul.f32 %v2616_v45, %v3219_v26  ;;  %v839_v14 = vmul.f32 %v3230_v46, %v3219_v26 }
 0x137   : > { %782 = vst [vmem:[#allocation5 + $0x28] sm:$0xff] %v668_v47  ;;  %798 = vst [vmem:[#allocation5 + $0xa8] sm:$0xff] %v732_v48  ;;  %v821_v62 = vmul.f32 %v3219_v26, %v668_v47  ;;  %v837_v0 = vmul.f32 %v3219_v26, %v732_v48 }
 0x13a   : > { %882 = vadd.xlane.f32.xlu1 %v833_v49  ;;  %850 = vadd.xlane.f32.xlu0 %v817_v50 }
 0x13b   : > { %v2619_v53 = vpop.f32.mrb[8].mxu0  ;;  %v2635_v54 = vpop.f32.mrb[8].mxu1 }
 0x13c   : > { %787 = vst [vmem:[#allocation5 + $0x50] sm:$0xff] %v2619_v53  ;;  %v681_v55 = vpop.f32.mrb[9].mxu0  ;;  %803 = vst [vmem:[#allocation5 + $0xd0] sm:$0xff] %v2635_v54  ;;  %v745_v56 = vpop.f32.mrb[9].mxu1  ;;  %v826_v4 = vmul.f32 %v2619_v53, %v3219_v26 }
 0x13d   : > { %785 = vst [vmem:[#allocation5 + $0x40] sm:$0xff] %v681_v55  ;;  %v2620_v57 = vpop.f32.mrb[10].mxu0  ;;  %801 = vst [vmem:[#allocation5 + $0xc0] sm:$0xff] %v745_v56  ;;  %v2636_v58 = vpop.f32.mrb[10].mxu1  ;;  %v824_v7 = vmul.f32 %v3219_v26, %v681_v55  ;;  %v840_v15 = vmul.f32 %v3219_v26, %v745_v56 }
 0x13e   : > { %860 = vadd.xlane.f32.xlu0 %v822_v51  ;;  %862 = vadd.xlane.f32.xlu1 %v823_v52  ;;  %788 = vst [vmem:[#allocation5 + $0x58] sm:$0xff] %v2620_v57  ;;  %v684_v59 = vpop.f32.mrb[11].mxu0  ;;  %804 = vst [vmem:[#allocation5 + $0xd8] sm:$0xff] %v2636_v58  ;;  %v748_v60 = vpop.f32.mrb[11].mxu1  ;;  %v827_v5 = vmul.f32 %v2620_v57, %v3219_v26 }
 0x13f   : > { %786 = vst [vmem:[#allocation5 + $0x48] sm:$0xff] %v684_v59  ;;  %802 = vst [vmem:[#allocation5 + $0xc8] sm:$0xff] %v748_v60  ;;  %v825_v8 = vmul.f32 %v3219_v26, %v684_v59 }
 0x142   : > { %856 = vadd.xlane.f32.xlu0 %v820_v61  ;;  %858 = vadd.xlane.f32.xlu1 %v821_v62 }
 0x143   : > { %v2623_v1 = vpop.f32.mrb[12].mxu0 }
 0x144   : > { %791 = vst [vmem:[#allocation5 + $0x70] sm:$0xff] %v2623_v1  ;;  %v697_v2 = vpop.f32.mrb[13].mxu0  ;;  %v830_v9 = vmul.f32 %v2623_v1, %v3219_v26 }
 0x145   : > { %789 = vst [vmem:[#allocation5 + $0x60] sm:$0xff] %v697_v2  ;;  %v2624_v3 = vpop.f32.mrb[14].mxu0  ;;  %v828_v12 = vmul.f32 %v3219_v26, %v697_v2 }
 0x146   : > { %888 = vadd.xlane.f32.xlu0 %v836_v63  ;;  %890 = vadd.xlane.f32.xlu1 %v837_v0  ;;  %792 = vst [vmem:[#allocation5 + $0x78] sm:$0xff] %v2624_v3  ;;  %v700_v6 = vpop.f32.mrb[15].mxu0  ;;  %v831_v10 = vmul.f32 %v2624_v3, %v3219_v26 }
 0x147   : > { %790 = vst [vmem:[#allocation5 + $0x68] sm:$0xff] %v700_v6  ;;  %v829_v11 = vmul.f32 %v3219_v26, %v700_v6 }
 0x14a   : > { %868 = vadd.xlane.f32.xlu0 %v826_v4  ;;  %870 = vadd.xlane.f32.xlu1 %v827_v5 }
 0x14e   : > { %864 = vadd.xlane.f32.xlu0 %v824_v7  ;;  %866 = vadd.xlane.f32.xlu1 %v825_v8 }
 0x152   : > { %876 = vadd.xlane.f32.xlu0 %v830_v9  ;;  %878 = vadd.xlane.f32.xlu1 %v831_v10 }
 0x156   : > { %872 = vadd.xlane.f32.xlu0 %v828_v12  ;;  %874 = vadd.xlane.f32.xlu1 %v829_v11 }
 0x15a   : > { %892 = vadd.xlane.f32.xlu0 %v838_v13  ;;  %894 = vadd.xlane.f32.xlu1 %v839_v14 }
 0x15e   : > { %896 = vadd.xlane.f32.xlu0 %v840_v15 }
 0x1bb   : > { %v885_v16 = vpop.xlane.xlu0 %884  ;;  %v853_v17 = vpop.xlane.xlu1 %852 }
 0x1bc   : > { %vm930_vm1 = vcmp.gt.f32.partialorder %v885_v16, 0.0  ;;  %v962_v29 = vmul.f32 0.2, %v885_v16  ;;  %vm914_vm2 = vcmp.gt.f32.partialorder %v853_v17, 0.0  ;;  %v946_v31 = vmul.f32 0.2, %v853_v17 }
 0x1be   : > { %v3263_v38 = vsel %vm930_vm1, %v885_v16, %v962_v29  ;;  %v3265_v39 = vsel %vm914_vm2, %v853_v17, %v946_v31 }
 0x1bf   : > { %v849_v18 = vpop.xlane.xlu0 %848  ;;  %v855_v19 = vpop.xlane.xlu1 %854 }
 0x1c0   : > { %v944_v32 = vmul.f32 0.2, %v849_v18  ;;  %v947_v33 = vmul.f32 0.2, %v855_v19  ;;  %vm912_vm3 = vcmp.gt.f32.partialorder %v849_v18, 0.0  ;;  %vm915_vm4 = vcmp.gt.f32.partialorder %v855_v19, 0.0 }
 0x1c2   : > { %v3267_v40 = vsel %vm912_vm3, %v849_v18, %v944_v32  ;;  %v3269_v41 = vsel %vm915_vm4, %v855_v19, %v947_v33 }
 0x1c3   : > { %v881_v20 = vpop.xlane.xlu0 %880  ;;  %v887_v21 = vpop.xlane.xlu1 %886 }
 0x1c4   : > { %v960_v34 = vmul.f32 0.2, %v881_v20  ;;  %v963_v35 = vmul.f32 0.2, %v887_v21  ;;  %vm928_vm5 = vcmp.gt.f32.partialorder %v881_v20, 0.0  ;;  %vm931_vm6 = vcmp.gt.f32.partialorder %v887_v21, 0.0 }
 0x1c6   : > { %v3271_v42 = vsel %vm928_vm5, %v881_v20, %v960_v34  ;;  %v3273_v43 = vsel %vm931_vm6, %v887_v21, %v963_v35 }
 0x1c7   : > { %v3254_v22 = vpop.xlane.xlu1 %882  ;;  %v3256_v23 = vpop.xlane.xlu0 %850 }
 0x1c8   : > { %vm929_vm11 = vcmp.gt.f32.partialorder %v3254_v22, 0.0  ;;  %v961_v52 = vmul.f32 0.2, %v3254_v22  ;;  %vm913_vm14 = vcmp.gt.f32.partialorder %v3256_v23, 0.0  ;;  %v945_v53 = vmul.f32 0.2, %v3256_v23 }
 0x1ca   : > { %v3296_v2 = vsel %vm929_vm11, %v3254_v22, %v961_v52  ;;  %v3301_v3 = vsel %vm913_vm14, %v3256_v23, %v945_v53  ;;  %vm1186_vm11 = vcmask 7168  }
 0x1cb   : > { %v861_v24 = vpop.xlane.xlu0 %860  ;;  %v863_v25 = vpop.xlane.xlu1 %862 }
 0x1cc   : > { %v950_v44 = vmul.f32 0.2, %v861_v24  ;;  %v951_v45 = vmul.f32 0.2, %v863_v25  ;;  %vm918_vm7 = vcmp.gt.f32.partialorder %v861_v24, 0.0  ;;  %vm919_vm8 = vcmp.gt.f32.partialorder %v863_v25, 0.0 }
 0x1ce   : > { %v3280_v54 = vsel %vm918_vm7, %v861_v24, %v950_v44  ;;  %v3283_v55 = vsel %vm919_vm8, %v863_v25, %v951_v45  ;;  %v2639_v44 = vpop.f32.mrb[12].mxu1 }
 0x1cf   : > { %v857_v27 = vpop.xlane.xlu0 %856  ;;  %v859_v28 = vpop.xlane.xlu1 %858  ;;  %v1043_v4 = vmax.f32 %v3265_v39, %v3280_v54  ;;  %v1044_v5 = vmax.f32 %v3269_v41, %v3283_v55  ;;  %807 = vst [vmem:[#allocation5 + $0xf0] sm:$0xff] %v2639_v44 }
 0x1d0   : > { %v948_v46 = vmul.f32 0.2, %v857_v27  ;;  %v949_v47 = vmul.f32 0.2, %v859_v28  ;;  %vm916_vm9 = vcmp.gt.f32.partialorder %v857_v27, 0.0  ;;  %vm917_vm10 = vcmp.gt.f32.partialorder %v859_v28, 0.0 }
 0x1d2   : > { %v3285_v56 = vsel %vm916_vm9, %v857_v27, %v948_v46  ;;  %v3287_v57 = vsel %vm917_vm10, %v859_v28, %v949_v47  ;;  %vm1257_vm10 = vcmask 0  }
 0x1d3   : > { %v3258_v30 = vpop.xlane.xlu0 %888  ;;  %v3260_v26 = vpop.xlane.xlu1 %890  ;;  %v1041_v10 = vmax.f32 %v3267_v40, %v3285_v56  ;;  %v1042_v11 = vmax.f32 %v3301_v3, %v3287_v57 }
 0x1d4   : > { %vm932_vm5 = vcmp.gt.f32.partialorder %v3258_v30, 0.0  ;;  %v965_v22 = vmul.f32 0.2, %v3260_v26  ;;  %v964_v25 = vmul.f32 0.2, %v3258_v30  ;;  %vm933_vm6 = vcmp.gt.f32.partialorder %v3260_v26, 0.0 }
 0x1d6   : > { %v3340_v45 = vsel %vm933_vm6, %v3260_v26, %v965_v22  ;;  %v3352_v26 = vsel %vm932_vm5, %v3258_v30, %v964_v25  ;;  %v3358_v25 = vld [vmem:[#allocation2] sm:$0x1] }
 0x1d7   : > { %v869_v36 = vpop.xlane.xlu0 %868  ;;  %v871_v37 = vpop.xlane.xlu1 %870 }
 0x1d8   : > { %v954_v48 = vmul.f32 0.2, %v869_v36  ;;  %v955_v49 = vmul.f32 0.2, %v871_v37  ;;  %vm922_vm12 = vcmp.gt.f32.partialorder %v869_v36, 0.0  ;;  %vm923_vm13 = vcmp.gt.f32.partialorder %v871_v37, 0.0 }
 0x1da   : > { %v3289_v60 = vsel %vm922_vm12, %v869_v36, %v954_v48  ;;  %v3291_v61 = vsel %vm923_vm13, %v871_v37, %v955_v49  ;;  %v761_v48 = vpop.f32.mrb[13].mxu1 }
 0x1db   : > { %v865_v50 = vpop.xlane.xlu0 %864  ;;  %v867_v51 = vpop.xlane.xlu1 %866  ;;  %v1047_v12 = vmax.f32 %v1043_v4, %v3289_v60  ;;  %v1048_v13 = vmax.f32 %v1044_v5, %v3291_v61  ;;  %805 = vst [vmem:[#allocation5 + $0xe0] sm:$0xff] %v761_v48 }
 0x1dc   : > { %v952_v58 = vmul.f32 0.2, %v865_v50  ;;  %v953_v59 = vmul.f32 0.2, %v867_v51  ;;  %vm920_vm15 = vcmp.gt.f32.partialorder %v865_v50, 0.0  ;;  %vm921_vm0 = vcmp.gt.f32.partialorder %v867_v51, 0.0 }
 0x1dd   : > { %v2640_v53 = vpop.f32.mrb[14].mxu1 }
 0x1de   : > { %v3307_v6 = vsel %vm920_vm15, %v865_v50, %v952_v58  ;;  %v3309_v7 = vsel %vm921_vm0, %v867_v51, %v953_v59  ;;  %808 = vst [vmem:[#allocation5 + $0xf8] sm:$0xff] %v2640_v53  ;;  %v764_v59 = vpop.f32.mrb[15].mxu1 }
 0x1df   : > { %v877_v62 = vpop.xlane.xlu0 %876  ;;  %v879_v63 = vpop.xlane.xlu1 %878  ;;  %v1045_v18 = vmax.f32 %v1041_v10, %v3307_v6  ;;  %v1046_v19 = vmax.f32 %v1042_v11, %v3309_v7  ;;  %806 = vst [vmem:[#allocation5 + $0xe8] sm:$0xff] %v764_v59 }
 0x1e0   : > { %vm926_vm1 = vcmp.gt.f32.partialorder %v877_v62, 0.0  ;;  %v958_v0 = vmul.f32 0.2, %v877_v62  ;;  %vm927_vm2 = vcmp.gt.f32.partialorder %v879_v63, 0.0  ;;  %v959_v1 = vmul.f32 0.2, %v879_v63 }
 0x1e2   : > { %v3311_v8 = vsel %vm926_vm1, %v877_v62, %v958_v0  ;;  %v3313_v9 = vsel %vm927_vm2, %v879_v63, %v959_v1 }
 0x1e3   : > { %v873_v14 = vpop.xlane.xlu0 %872  ;;  %v875_v15 = vpop.xlane.xlu1 %874  ;;  %v1051_v20 = vmax.f32 %v1047_v12, %v3311_v8  ;;  %v1052_v21 = vmax.f32 %v1048_v13, %v3313_v9 }
 0x1e4   : > { %vm924_vm3 = vcmp.gt.f32.partialorder %v873_v14, 0.0  ;;  %v956_v16 = vmul.f32 0.2, %v873_v14  ;;  %vm925_vm4 = vcmp.gt.f32.partialorder %v875_v15, 0.0  ;;  %v957_v17 = vmul.f32 0.2, %v875_v15 }
 0x1e5   : > { %v1055_v36 = vmax.f32 %v1051_v20, %v3263_v38  ;;  %v1056_v37 = vmax.f32 %v1052_v21, %v3273_v43 }
 0x1e6   : > { %v3327_v23 = vsel %vm924_vm3, %v873_v14, %v956_v16  ;;  %v3329_v24 = vsel %vm925_vm4, %v875_v15, %v957_v17 }
 0x1e7   : > { %v1049_v27 = vmax.f32 %v1045_v18, %v3327_v23  ;;  %v1050_v28 = vmax.f32 %v1046_v19, %v3329_v24  ;;  %v893_v29 = vpop.xlane.xlu0 %892  ;;  %v895_v31 = vpop.xlane.xlu1 %894  ;;  %v1085_v18 = vlaneseq }
 0x1e8   : > { %vm934_vm7 = vcmp.gt.f32.partialorder %v893_v29, 0.0  ;;  %v966_v32 = vmul.f32 0.2, %v893_v29  ;;  %vm935_vm8 = vcmp.gt.f32.partialorder %v895_v31, 0.0  ;;  %v967_v33 = vmul.f32 0.2, %v895_v31 }
 0x1e9   : > { %v1053_v34 = vmax.f32 %v1049_v27, %v3271_v42  ;;  %v1054_v35 = vmax.f32 %v1050_v28, %v3296_v2  ;;  %v1086_v21 = vshrl.u32 %v1085_v18, 7 }
 0x1ea   : > { %v3342_v46 = vsel %vm934_vm7, %v893_v29, %v966_v32  ;;  %v3344_v47 = vsel %vm935_vm8, %v895_v31, %v967_v33 }
 0x1eb   : > { %v1059_v49 = vmax.f32 %v1055_v36, %v3342_v46  ;;  %v1060_v50 = vmax.f32 %v1056_v37, %v3344_v47  ;;  %v897_v51 = vpop.xlane.xlu0 %896  ;;  %v1058_v52 = vmax.f32 %v1054_v35, %v3340_v45  ;;  %v1057_v0 = vmax.f32 %v1053_v34, %v3352_v26 }
 0x1ec   : > { %vm936_vm9 = vcmp.gt.f32.partialorder %v897_v51, 0.0  ;;  %v968_v58 = vmul.f32 0.2, %v897_v51  ;;  %v1087_v28 = vsub.s32 0, %v1086_v21 }
 0x1ed   : > { %v1063_v62 = vmax.f32 %v1059_v49, -1e+30  ;;  %v1064_v63 = vmax.f32 %v1060_v50, -1e+30  ;;  %v1062_v1 = vmax.f32 %v1058_v52, -1e+30 }
 0x1ee   : > { %v3355_v4 = vsel %vm936_vm9, %v897_v51, %v968_v58 }
 0x1ef   : > { %v1067_v5 = vmax.f32 %v1063_v62, -1e+30  ;;  %v1068_v10 = vmax.f32 %v1064_v63, -1e+30  ;;  %v1061_v11 = vmax.f32 %v1057_v0, %v3355_v4  ;;  %v1066_v13 = vmax.f32 %v1062_v1, -1e+30 }
 0x1f1   : > { %v1065_v12 = vmax.f32 %v1061_v11, -1e+30  ;;  %v1070_v30 = vmax.f32 %v1067_v5, %v1068_v10 }
 0x1f3   : > { %v1069_v14 = vmax.f32 %v1065_v12, %v1066_v13 }
 0x1f5   : > { %v1071_v15 = vmax.f32 %v1069_v14, %v1070_v30 }
 0x1f7   : > { %v1072_v16 = vrot.slane %v1071_v15, 4 }
 0x1f9   : > { %v1073_v17 = vmax.f32 %v1071_v15, %v1072_v16 }
 0x1fb   : > { %v1074_v19 = vrot.slane %v1073_v17, 2 }
 0x1fd   : > { %v1075_v20 = vmax.f32 %v1073_v17, %v1074_v19 }
 0x1ff   : > { %v1076_v22 = vrot.slane %v1075_v20, 1 }
 0x201   : > { %v1077_v27 = vmax.f32 %v1075_v20, %v1076_v22 }
 0x203   : > { %v3361_v29 = vmax.f32 %v3358_v25, %v1077_v27 }
 0x205   : > { %v1080_v31 = vsub.f32 %v3358_v25, %v3361_v29  ;;  %1259 = vst.msk [vmem:[#allocation2] sm:$0x1] %vm1257_vm10, %v3361_v29  ;;  %v3368_v32 = vrot.slane %v3361_v29, %v1087_v28 }
 0x207   : > { %v1090_v33 = vsub.f32 %v3267_v40, %v3368_v32  ;;  %v1091_v34 = vsub.f32 %v3301_v3, %v3368_v32  ;;  %v1092_v35 = vsub.f32 %v3265_v39, %v3368_v32  ;;  %v1093_v36 = vsub.f32 %v3269_v41, %v3368_v32 }
 0x208   : > { %v1094_v37 = vsub.f32 %v3285_v56, %v3368_v32  ;;  %v1095_v50 = vsub.f32 %v3287_v57, %v3368_v32  ;;  %v1096_v40 = vsub.f32 %v3280_v54, %v3368_v32  ;;  %v1097_v39 = vsub.f32 %v3283_v55, %v3368_v32 }
 0x209   : > { %v1122_v44 = vmul.f32 1.442695, %v1090_v33  ;;  %v1124_v48 = vmul.f32 1.442695, %v1091_v34  ;;  %v1126_v49 = vmul.f32 1.442695, %v1092_v35  ;;  %v1098_v56 = vsub.f32 %v3307_v6, %v3368_v32 }
 0x20a   : > { %v1128_v51 = vmul.f32 1.442695, %v1093_v36  ;;  %v1130_v3 = vmul.f32 1.442695, %v1094_v37  ;;  %v1132_v41 = vmul.f32 1.442695, %v1095_v50  ;;  %v1099_v57 = vsub.f32 %v3309_v7, %v3368_v32 }
 0x20b   : > { %2790 = vpow2.f32 %v1122_v44  ;;  %v1134_v52 = vmul.f32 1.442695, %v1096_v40  ;;  %v1136_v53 = vmul.f32 1.442695, %v1097_v39  ;;  %v1100_v54 = vsub.f32 %v3289_v60, %v3368_v32 }
 0x20c   : > { %2792 = vpow2.f32 %v1124_v48  ;;  %v1138_v58 = vmul.f32 1.442695, %v1098_v56  ;;  %v1101_v62 = vsub.f32 %v3291_v61, %v3368_v32  ;;  %v1140_v6 = vmul.f32 1.442695, %v1099_v57 }
 0x20d   : > { %2794 = vpow2.f32 %v1126_v49  ;;  %v1102_v5 = vsub.f32 %v3327_v23, %v3368_v32  ;;  %v1142_v60 = vmul.f32 1.442695, %v1100_v54  ;;  %v1103_v61 = vsub.f32 %v3329_v24, %v3368_v32 }
 0x20e   : > { %2796 = vpow2.f32 %v1128_v51  ;;  %v1144_v13 = vmul.f32 1.442695, %v1101_v62  ;;  %v1104_v16 = vsub.f32 %v3311_v8, %v3368_v32  ;;  %v1105_v20 = vsub.f32 %v3313_v9, %v3368_v32 }
 0x20f   : > { %2798 = vpow2.f32 %v1130_v3  ;;  %v1146_v23 = vmul.f32 1.442695, %v1102_v5  ;;  %v1148_v24 = vmul.f32 1.442695, %v1103_v61  ;;  %v1106_v28 = vsub.f32 %v3271_v42, %v3368_v32 }
 0x210   : > { %2800 = vpow2.f32 %v1132_v41  ;;  %v1150_v8 = vmul.f32 1.442695, %v1104_v16  ;;  %v1107_v36 = vsub.f32 %v3296_v2, %v3368_v32  ;;  %v1152_v9 = vmul.f32 1.442695, %v1105_v20 }
 0x211   : > { %2802 = vpow2.f32 %v1134_v52  ;;  %v1108_v49 = vsub.f32 %v3263_v38, %v3368_v32  ;;  %v1154_v42 = vmul.f32 1.442695, %v1106_v28  ;;  %v1109_v3 = vsub.f32 %v3273_v43, %v3368_v32 }
 0x212   : > { %2804 = vpow2.f32 %v1136_v53  ;;  %v1156_v2 = vmul.f32 1.442695, %v1107_v36  ;;  %v1110_v52 = vsub.f32 %v3352_v26, %v3368_v32 }
 0x213   : > { %2806 = vpow2.f32 %v1138_v58  ;;  %v1158_v38 = vmul.f32 1.442695, %v1108_v49  ;;  %v1111_v58 = vsub.f32 %v3340_v45, %v3368_v32  ;;  %v1160_v43 = vmul.f32 1.442695, %v1109_v3 }
 0x214   : > { %2808 = vpow2.f32 %v1140_v6  ;;  %v1112_v6 = vsub.f32 %v3342_v46, %v3368_v32  ;;  %v1162_v26 = vmul.f32 1.442695, %v1110_v52 }
 0x215   : > { %v2791_v59 = vpop.eup %2790  ;;  %2810 = vpow2.f32 %v1142_v60  ;;  %v1164_v45 = vmul.f32 1.442695, %v1111_v58 }
 0x216   : > { %v2793_v55 = vpop.eup %2792  ;;  %v1187_v63 = vsel %vm1186_vm11, %v2791_v59, 0.0  ;;  %2812 = vpow2.f32 %v1144_v13  ;;  %v1166_v46 = vmul.f32 1.442695, %v1112_v6 }
 0x217   : > { %v2795_v0 = vpop.eup %2794  ;;  %v1188_v7 = vsel %vm1186_vm11, %v2793_v55, 0.0  ;;  %2814 = vpow2.f32 %v1146_v23 }
 0x218   : > { %v2797_v1 = vpop.eup %2796  ;;  %v1189_v10 = vadd.f32 %v1188_v7, %v1187_v63  ;;  %v1190_v11 = vsel %vm1186_vm11, %v2795_v0, 0.0  ;;  %2816 = vpow2.f32 %v1148_v24 }
 0x219   : > { %v2799_v12 = vpop.eup %2798  ;;  %v1192_v14 = vsel %vm1186_vm11, %v2797_v1, 0.0  ;;  %2818 = vpow2.f32 %v1150_v8  ;;  %v1113_v1 = vsub.f32 %v3344_v47, %v3368_v32 }
 0x21a   : > { %v1191_v30 = vadd.f32 %v1190_v11, %v1189_v10  ;;  %v2801_v15 = vpop.eup %2800  ;;  %v1194_v18 = vsel %vm1186_vm11, %v2799_v12, 0.0  ;;  %2820 = vpow2.f32 %v1152_v9  ;;  %v1114_v11 = vsub.f32 %v3355_v4, %v3368_v32 }
 0x21b   : > { %v2803_v19 = vpop.eup %2802  ;;  %v1196_v22 = vsel %vm1186_vm11, %v2801_v15, 0.0  ;;  %2822 = vpow2.f32 %v1154_v42 }
 0x21c   : > { %v1193_v17 = vadd.f32 %v1192_v14, %v1191_v30  ;;  %v2805_v27 = vpop.eup %2804  ;;  %v1198_v34 = vsel %vm1186_vm11, %v2803_v19, 0.0  ;;  %2824 = vpow2.f32 %v1156_v2  ;;  %v1115_v30 = vsub.f32 -1e+30, %v3368_v32 }
 0x21d   : > { %v2807_v35 = vpop.eup %2806  ;;  %v1200_v44 = vsel %vm1186_vm11, %v2805_v27, 0.0  ;;  %2826 = vpow2.f32 %v1158_v38  ;;  %v1168_v14 = vmul.f32 1.442695, %v1113_v1  ;;  %v1170_v23 = vmul.f32 1.442695, %v1114_v11 }
 0x21e   : > { %v1195_v21 = vadd.f32 %v1194_v18, %v1193_v17  ;;  %v2809_v48 = vpop.eup %2808  ;;  %v1202_v51 = vsel %vm1186_vm11, %v2807_v35, 0.0  ;;  %2828 = vpow2.f32 %v1160_v43  ;;  %v1172_v19 = vmul.f32 1.442695, %v1115_v30 }
 0x21f   : > { %v2811_v40 = vpop.eup %2810  ;;  %v1204_v41 = vsel %vm1186_vm11, %v2809_v48, 0.0  ;;  %2830 = vpow2.f32 %v1162_v26 }
 0x220   : > { %v1197_v33 = vadd.f32 %v1196_v22, %v1195_v21  ;;  %v2813_v56 = vpop.eup %2812  ;;  %v1206_v53 = vsel %vm1186_vm11, %v2811_v40, 0.0  ;;  %2832 = vpow2.f32 %v1164_v45 }
 0x221   : > { %v2815_v54 = vpop.eup %2814  ;;  %v1208_v55 = vsel %vm1186_vm11, %v2813_v56, 0.0  ;;  %2834 = vpow2.f32 %v1166_v46 }
 0x222   : > { %v1199_v37 = vadd.f32 %v1198_v34, %v1197_v33  ;;  %v2817_v62 = vpop.eup %2816  ;;  %v1210_v0 = vsel %vm1186_vm11, %v2815_v54, 0.0  ;;  %2836 = vpow2.f32 %v1168_v14 }
 0x223   : > { %v2819_v7 = vpop.eup %2818  ;;  %v1212_v60 = vsel %vm1186_vm11, %v2817_v62, 0.0  ;;  %2838 = vpow2.f32 %v1170_v23 }
 0x224   : > { %v1201_v50 = vadd.f32 %v1200_v44, %v1199_v37  ;;  %v2821_v10 = vpop.eup %2820  ;;  %v1214_v61 = vsel %vm1186_vm11, %v2819_v7, 0.0  ;;  %2840 = vpow2.f32 %v1172_v19 }
 0x225   : > { %v2823_v13 = vpop.eup %2822  ;;  %v1216_v15 = vsel %vm1186_vm11, %v2821_v10, 0.0 }
 0x226   : > { %v1203_v39 = vadd.f32 %v1202_v51, %v1201_v50  ;;  %v2825_v16 = vpop.eup %2824  ;;  %v1218_v18 = vsel %vm1186_vm11, %v2823_v13, 0.0 }
 0x227   : > { %v2827_v4 = vpop.eup %2826  ;;  %v1220_v24 = vsel %vm1186_vm11, %v2825_v16, 0.0 }
 0x228   : > { %v1205_v57 = vadd.f32 %v1204_v41, %v1203_v39  ;;  %v2829_v21 = vpop.eup %2828  ;;  %v1222_v22 = vsel %vm1186_vm11, %v2827_v4, 0.0 }
 0x229   : > { %v2831_v27 = vpop.eup %2830  ;;  %v1224_v8 = vsel %vm1186_vm11, %v2829_v21, 0.0 }
 0x22a   : > { %v1207_v59 = vadd.f32 %v1206_v53, %v1205_v57  ;;  %v2833_v33 = vpop.eup %2832  ;;  %v1226_v35 = vsel %vm1186_vm11, %v2831_v27, 0.0  ;;  %v1081_v53 = vmul.f32 1.442695, %v1080_v31 }
 0x22b   : > { %v2835_v36 = vpop.eup %2834  ;;  %v1228_v37 = vsel %vm1186_vm11, %v2833_v33, 0.0 }
 0x22c   : > { %v1209_v63 = vadd.f32 %v1208_v55, %v1207_v59  ;;  %v2837_v44 = vpop.eup %2836  ;;  %v1230_v49 = vsel %vm1186_vm11, %v2835_v36, 0.0  ;;  %2842 = vpow2.f32 %v1081_v53 }
 0x22d   : > { %v2839_v42 = vpop.eup %2838  ;;  %v1232_v51 = vsel %vm1186_vm11, %v2837_v44, 0.0 }
 0x22e   : > { %v1211_v5 = vadd.f32 %v1210_v0, %v1209_v63  ;;  %v2841_v40 = vpop.eup %2840  ;;  %v1234_v2 = vsel %vm1186_vm11, %v2839_v42, 0.0  ;;  %v1079_v63 = vld [vmem:[#allocation3] sm:$0x1] }
 0x22f   : > { %v1236_v41 = vsel %vm1186_vm11, %v2841_v40, 0.0 }
 0x230   : > { %v1213_v12 = vadd.f32 %v1212_v60, %v1211_v5 }
 0x232   : > { %v1215_v47 = vadd.f32 %v1214_v61, %v1213_v12 }
 0x234   : > { %v1217_v17 = vadd.f32 %v1216_v15, %v1215_v47 }
 0x236   : > { %v1219_v20 = vadd.f32 %v1218_v18, %v1217_v17  ;;  %v2843_v26 = vpop.eup %2842 }
 0x237   : > { %v1083_v7 = vmul.f32 %v2843_v26, %v1079_v63 }
 0x238   : > { %v1221_v32 = vadd.f32 %v1220_v24, %v1219_v20 }
 0x23a   : > { %v1223_v28 = vadd.f32 %v1222_v22, %v1221_v32 }
 0x23c   : > { %v1225_v34 = vadd.f32 %v1224_v8, %v1223_v28 }
 0x23e   : > { %v1227_v9 = vadd.f32 %v1226_v35, %v1225_v34 }
 0x240   : > { %v1229_v48 = vadd.f32 %v1228_v37, %v1227_v9 }
 0x242   : > { %v1231_v50 = vadd.f32 %v1230_v49, %v1229_v48 }
 0x244   : > { %v1233_v3 = vadd.f32 %v1232_v51, %v1231_v50 }
 0x246   : > { %v1235_v39 = vadd.f32 %v1234_v2, %v1233_v3 }
 0x248   : > { %v1237_v56 = vadd.f32 %v1236_v41, %v1235_v39 }
 0x24a   : > { %v1239_v52 = vadd.f32 %v1237_v56, %v1236_v41 }
 0x24c   : > { %v1241_v38 = vadd.f32 %v1239_v52, %v1236_v41 }
 0x24e   : > { %v1243_v57 = vadd.f32 %v1241_v38, %v1236_v41 }
 0x250   : > { %v1245_v54 = vadd.f32 %v1243_v57, %v1236_v41 }
 0x252   : > { %v1247_v58 = vadd.f32 %v1245_v54, %v1236_v41 }
 0x254   : > { %v1249_v43 = vadd.f32 %v1247_v58, %v1236_v41 }
 0x256   : > { %v1250_v59 = vrot.slane %v1249_v43, 4 }
 0x258   : > { %v1251_v55 = vadd.f32 %v1250_v59, %v1249_v43 }
 0x25a   : > { %v1252_v62 = vrot.slane %v1251_v55, 2 }
 0x25c   : > { %v1253_v6 = vadd.f32 %v1252_v62, %v1251_v55 }
 0x25e   : > { %v1254_v0 = vrot.slane %v1253_v6, 1 }
 0x260   : > { %v1255_v1 = vadd.f32 %v1254_v0, %v1253_v6 }
 0x262   : > { %v1256_v45 = vadd.f32 %v1255_v1, %v1083_v7 }
 0x264   : > { %1258 = vst.msk [vmem:[#allocation3] sm:$0x1] %vm1257_vm10, %v1256_v45 }
 0x265 PF: > { %p1260_p6 = scmp.eq.s32.totalorder %s3050_s21, 1  ;;  %p2510_p8 = scmp.ne.s32.totalorder %s3050_s21, 1 }
 0x266   : > { %v3453_v25 = vld [vmem:[#allocation5] sm:$0xff] (!%p2510_p8)  ;;  %v3458_v29 = vld [vmem:[%s4055_s2] ss:$0 sm:$0xff] (!%p2510_p8)  ;;  %v3460_v31 = vld [vmem:[#allocation5 + $0x8] sm:$0xff] (!%p2510_p8)  ;;  %v3065_v10 = vmov (!%p2510_p8), 0   ;;  %v1634_v55 = vlaneseq (!%p2510_p8) }
 0x267   : > { %1263 = sbr.rel (%p2510_p8) target bundleno = 1030 (0x406), region = 60  ;;  %v1304_v5 = vmul.f32 (!%p2510_p8), %v3458_v29, %v3453_v25  ;;  %v3464_v60 = vld [vmem:[#allocation5 + $0x10] sm:$0xff] (!%p2510_p8)  ;;  %2844 = vset.pattern.permute.xlu1 (!%p2510_p8), %v3065_v10  ;;  %2845 = vset.pattern.permute.xlu0 (!%p2510_p8), %v3065_v10  ;;  %v3468_v46 = vld [vmem:[#allocation5 + $0x18] sm:$0xff] (!%p2510_p8)  ;;  %v1305_v12 = vmul.f32 (!%p2510_p8), %v3458_v29, %v3460_v31  ;;  %v3472_v61 = vld [vmem:[#allocation5 + $0x20] sm:$0xff] (!%p2510_p8) }
 0x268   : > { %v1306_v11 = vmul.f32 (!%p2510_p8), %v3458_v29, %v3464_v60  ;;  %v1307_v13 = vmul.f32 (!%p2510_p8), %v3458_v29, %v3468_v46  ;;  %v3476_v30 = vld [vmem:[#allocation5 + $0x28] sm:$0xff] (!%p2510_p8)  ;;  %v1308_v14 = vmul.f32 (!%p2510_p8), %v3458_v29, %v3472_v61  ;;  %v3480_v47 = vld [vmem:[#allocation5 + $0x30] sm:$0xff] (!%p2510_p8)  ;;  %v3484_v16 = vld [vmem:[#allocation5 + $0x38] sm:$0xff] (!%p2510_p8)  ;;  %v1635_v6 = vshrl.u32 (!%p2510_p8), %v1634_v55, 7 }
 0x269   : > { %1336 = vadd.xlane.f32.xlu0 (!%p2510_p8), %v1304_v5  ;;  %v1309_v15 = vmul.f32 (!%p2510_p8), %v3458_v29, %v3476_v30  ;;  %v1310_v23 = vmul.f32 (!%p2510_p8), %v3458_v29, %v3480_v47  ;;  %v3488_v17 = vld [vmem:[#allocation5 + $0x40] sm:$0xff] (!%p2510_p8)  ;;  %v1311_v18 = vmul.f32 (!%p2510_p8), %v3458_v29, %v3484_v16  ;;  %v3492_v4 = vld [vmem:[#allocation5 + $0x48] sm:$0xff] (!%p2510_p8)  ;;  %v3496_v20 = vld [vmem:[#allocation5 + $0x50] sm:$0xff] (!%p2510_p8) }
 0x26a   : > { %1340 = vadd.xlane.f32.xlu1 (!%p2510_p8), %v1306_v11  ;;  %v1312_v19 = vmul.f32 (!%p2510_p8), %v3458_v29, %v3488_v17  ;;  %v1313_v24 = vmul.f32 (!%p2510_p8), %v3458_v29, %v3492_v4  ;;  %v3500_v21 = vld [vmem:[#allocation5 + $0x58] sm:$0xff] (!%p2510_p8)  ;;  %v1314_v32 = vmul.f32 (!%p2510_p8), %v3458_v29, %v3496_v20  ;;  %v3504_v22 = vld [vmem:[#allocation5 + $0x60] sm:$0xff] (!%p2510_p8)  ;;  %v3508_v28 = vld [vmem:[#allocation5 + $0x68] sm:$0xff] (!%p2510_p8)  ;;  %v1636_v26 = vsub.s32 (!%p2510_p8), 0, %v1635_v6 }
 0x26b   : > { %v1315_v27 = vmul.f32 (!%p2510_p8), %v3458_v29, %v3500_v21  ;;  %v1316_v8 = vmul.f32 (!%p2510_p8), %v3458_v29, %v3504_v22  ;;  %v3512_v33 = vld [vmem:[#allocation5 + $0x70] sm:$0xff] (!%p2510_p8)  ;;  %v1317_v34 = vmul.f32 (!%p2510_p8), %v3458_v29, %v3508_v28  ;;  %v3516_v35 = vld [vmem:[#allocation5 + $0x78] sm:$0xff] (!%p2510_p8)  ;;  %v3520_v9 = vld [vmem:[#allocation5 + $0x80] sm:$0xff] (!%p2510_p8) }
 0x26c   : > { %v1318_v36 = vmul.f32 (!%p2510_p8), %v3458_v29, %v3512_v33  ;;  %v1319_v37 = vmul.f32 (!%p2510_p8), %v3458_v29, %v3516_v35  ;;  %v1282_v44 = vld [vmem:[#allocation5 + $0x88] sm:$0xff] (!%p2510_p8)  ;;  %v1320_v48 = vmul.f32 (!%p2510_p8), %v3458_v29, %v3520_v9  ;;  %v3526_v49 = vld [vmem:[#allocation5 + $0x90] sm:$0xff] (!%p2510_p8)  ;;  %v1284_v50 = vld [vmem:[#allocation5 + $0x98] sm:$0xff] (!%p2510_p8) }
 0x26d   : > { %1338 = vadd.xlane.f32.xlu0 (!%p2510_p8), %v1305_v12  ;;  %v1321_v42 = vmul.f32 (!%p2510_p8), %v3458_v29, %v1282_v44  ;;  %v1322_v51 = vmul.f32 (!%p2510_p8), %v3458_v29, %v3526_v49  ;;  %v3531_v40 = vld [vmem:[#allocation5 + $0xa0] sm:$0xff] (!%p2510_p8)  ;;  %v1323_v3 = vmul.f32 (!%p2510_p8), %v3458_v29, %v1284_v50  ;;  %v1286_v2 = vld [vmem:[#allocation5 + $0xa8] sm:$0xff] (!%p2510_p8)  ;;  %v3534_v39 = vld [vmem:[#allocation2] ss:$0 sm:$0xff] (!%p2510_p8) }
 0x26e   : > { %1342 = vadd.xlane.f32.xlu1 %v1307_v13  ;;  %v1324_v41 = vmul.f32 %v3458_v29, %v3531_v40  ;;  %v1287_v56 = vld [vmem:[#allocation5 + $0xb0] sm:$0xff]  ;;  %v1325_v52 = vmul.f32 %v3458_v29, %v1286_v2  ;;  %v1560_v38 = vsub.f32 -1e+30, %v3534_v39  ;;  %v1288_v57 = vld [vmem:[#allocation5 + $0xb8] sm:$0xff]  ;;  %v1289_v58 = vld [vmem:[#allocation5 + $0xc0] sm:$0xff] }
 0x26f   : > { %v1631_v53 = vld [vmem:[#allocation3] sm:$0x1]  ;;  %v1326_v54 = vmul.f32 %v3458_v29, %v1287_v56  ;;  %v1327_v43 = vmul.f32 %v3458_v29, %v1288_v57  ;;  %v1328_v62 = vmul.f32 %v3458_v29, %v1289_v58  ;;  %v2026_v29 = vld [vmem:[%s4056_s3 + $0x10] sm:$0xff]  ;;  %v2025_v10 = vld [vmem:[%s4056_s3 + $0x8] sm:$0xff] }
 0x270   : > { %v1617_v59 = vmul.f32 1.442695, %v1560_v38  ;;  %2846 = vrcp.f32 %v1631_v53  ;;  %v2024_v45 = vld [vmem:[%s4056_s3] sm:$0xff]  ;;  %v2030_v11 = vld [vmem:[%s4056_s3 + $0x30] sm:$0xff]  ;;  %v2027_v12 = vld [vmem:[%s4056_s3 + $0x18] sm:$0xff] }
 0x271   : > { %1344 = vadd.xlane.f32.xlu0 %v1308_v14  ;;  %v2028_v5 = vld [vmem:[%s4056_s3 + $0x20] sm:$0xff]  ;;  %v2029_v14 = vld [vmem:[%s4056_s3 + $0x28] sm:$0xff] }
 0x272   : > { %1346 = vadd.xlane.f32.xlu1 %v1309_v15  ;;  %2848 = vpow2.f32 %v1617_v59  ;;  %v2032_v13 = vld [vmem:[%s4056_s3 + $0x40] sm:$0xff]  ;;  %v2034_v15 = vld [vmem:[%s4056_s3 + $0x50] sm:$0xff] }
 0x275   : > { %1348 = vadd.xlane.f32.xlu0 %v1310_v23  ;;  %v2031_v23 = vld [vmem:[%s4056_s3 + $0x38] sm:$0xff] }
 0x276   : > { %1350 = vadd.xlane.f32.xlu1 %v1311_v18  ;;  %v2036_v18 = vld [vmem:[%s4056_s3 + $0x60] sm:$0xff] }
 0x279   : > { %1352 = vadd.xlane.f32.xlu0 %v1312_v19  ;;  %v2033_v19 = vld [vmem:[%s4056_s3 + $0x48] sm:$0xff] }
 0x27a   : > { %1354 = vadd.xlane.f32.xlu1 %v1313_v24  ;;  %v2847_v63 = vpop.eup %2846  ;;  %v2035_v24 = vld [vmem:[%s4056_s3 + $0x58] sm:$0xff] }
 0x27b   : > { %v3543_v0 = vrot.slane %v2847_v63, %v1636_v26 }
 0x27c   : > { %v2849_v7 = vpop.eup %2848 }
 0x27d   : > { %1356 = vadd.xlane.f32.xlu0 %v1314_v32  ;;  %v3546_v1 = vmul.f32 %v2849_v7, %v3543_v0 }
 0x27e   : > { %1358 = vadd.xlane.f32.xlu1 %v1315_v27 }
 0x281   : > { %1360 = vadd.xlane.f32.xlu0 %v1316_v8 }
 0x282   : > { %1362 = vadd.xlane.f32.xlu1 %v1317_v34 }
 0x285   : > { %1364 = vadd.xlane.f32.xlu0 %v1318_v36 }
 0x286   : > { %1366 = vadd.xlane.f32.xlu1 %v1319_v37 }
 0x289   : > { %1368 = vadd.xlane.f32.xlu0 %v1320_v48 }
 0x28a   : > { %1370 = vadd.xlane.f32.xlu1 %v1321_v42 }
 0x28d   : > { %1372 = vadd.xlane.f32.xlu0 %v1322_v51 }
 0x28e   : > { %1374 = vadd.xlane.f32.xlu1 %v1323_v3 }
 0x291   : > { %1376 = vadd.xlane.f32.xlu0 %v1324_v41 }
 0x292   : > { %1378 = vadd.xlane.f32.xlu1 %v1325_v52 }
 0x295   : > { %1380 = vadd.xlane.f32.xlu0 %v1326_v54 }
 0x296   : > { %1382 = vadd.xlane.f32.xlu1 %v1327_v43 }
 0x299   : > { %1384 = vadd.xlane.f32.xlu0 %v1328_v62 }
 0x2a7   : > { %1798 = vperm.xlu1 %2844, %v3546_v1  }
 0x2ab   : > { %1808 = vperm.xlu1 %2844, %v3546_v1  }
 0x2af   : > { %2058 = vperm.xlu1 %2844, %v2024_v45   ;;  %1803 = vperm.xlu0 %2845, %v3546_v1  }
 0x2b3   : > { %2068 = vperm.xlu1 %2844, %v2026_v29   ;;  %1813 = vperm.xlu0 %2845, %v3546_v1  }
 0x2b7   : > { %2078 = vperm.xlu1 %2844, %v2028_v5   ;;  %2063 = vperm.xlu0 %2845, %v2025_v10  }
 0x2bb   : > { %2088 = vperm.xlu1 %2844, %v2030_v11   ;;  %2073 = vperm.xlu0 %2845, %v2027_v12  }
 0x2bf   : > { %2098 = vperm.xlu1 %2844, %v2032_v13   ;;  %2083 = vperm.xlu0 %2845, %v2029_v14  }
 0x2c3   : > { %2108 = vperm.xlu1 %2844, %v2034_v15   ;;  %2093 = vperm.xlu0 %2845, %v2031_v23  }
 0x2c7   : > { %2118 = vperm.xlu1 %2844, %v2036_v18   ;;  %2103 = vperm.xlu0 %2845, %v2033_v19  }
 0x2cb   : > { %2113 = vperm.xlu0 %2845, %v2035_v24   ;;  %v2038_v24 = vld [vmem:[%s4056_s3 + $0x70] sm:$0xff] }
 0x2f6   : > { %v1337_v32 = vpop.xlane.xlu0 %1336 }
 0x2f7   : > { %vm1400_vm12 = vcmp.gt.f32.partialorder %v1337_v32, 0.0  ;;  %v1432_v27 = vmul.f32 0.2, %v1337_v32  ;;  %v1341_v8 = vpop.xlane.xlu1 %1340 }
 0x2f8   : > { %v1434_v36 = vmul.f32 0.2, %v1341_v8  ;;  %vm1402_vm13 = vcmp.gt.f32.partialorder %v1341_v8, 0.0 }
 0x2f9   : > { %v1464_v34 = vsel %vm1400_vm12, %v1337_v32, %v1432_v27 }
 0x2fa   : > { %v1535_v37 = vsub.f32 %v1464_v34, %v3534_v39  ;;  %v1339_v44 = vpop.xlane.xlu0 %1338  ;;  %v1466_v3 = vsel %vm1402_vm13, %v1341_v8, %v1434_v36 }
 0x2fb   : > { %vm1401_vm14 = vcmp.gt.f32.partialorder %v1339_v44, 0.0  ;;  %v1433_v48 = vmul.f32 0.2, %v1339_v44  ;;  %v1343_v42 = vpop.xlane.xlu1 %1342  ;;  %v1537_v57 = vsub.f32 %v1466_v3, %v3534_v39 }
 0x2fc   : > { %v1567_v50 = vmul.f32 1.442695, %v1535_v37  ;;  %v1435_v2 = vmul.f32 0.2, %v1343_v42  ;;  %vm1403_vm15 = vcmp.gt.f32.partialorder %v1343_v42, 0.0 }
 0x2fd   : > { %v1465_v51 = vsel %vm1401_vm14, %v1339_v44, %v1433_v48  ;;  %v1571_v55 = vmul.f32 1.442695, %v1537_v57 }
 0x2fe   : > { %2850 = vpow2.f32 %v1567_v50  ;;  %v1536_v41 = vsub.f32 %v1465_v51, %v3534_v39  ;;  %v1345_v56 = vpop.xlane.xlu0 %1344  ;;  %v1467_v54 = vsel %vm1403_vm15, %v1343_v42, %v1435_v2  ;;  %v2040_v50 = vld [vmem:[%s4056_s3 + $0x80] sm:$0xff]  ;;  %v2037_v51 = vld [vmem:[%s4056_s3 + $0x68] sm:$0xff] }
 0x2ff   : > { %v1347_v52 = vpop.xlane.xlu1 %1346  ;;  %v1436_v53 = vmul.f32 0.2, %v1345_v56  ;;  %vm1404_vm0 = vcmp.gt.f32.partialorder %v1345_v56, 0.0  ;;  %v1538_v62 = vsub.f32 %v1467_v54, %v3534_v39 }
 0x300   : > { %v1569_v38 = vmul.f32 1.442695, %v1536_v41  ;;  %v1437_v43 = vmul.f32 0.2, %v1347_v52  ;;  %vm1405_vm1 = vcmp.gt.f32.partialorder %v1347_v52, 0.0 }
 0x301   : > { %v1468_v6 = vsel %vm1404_vm0, %v1345_v56, %v1436_v53  ;;  %v1573_v10 = vmul.f32 1.442695, %v1538_v62 }
 0x302   : > { %2852 = vpow2.f32 %v1569_v38  ;;  %v1349_v58 = vpop.xlane.xlu0 %1348  ;;  %v1469_v63 = vsel %vm1405_vm1, %v1347_v52, %v1437_v43  ;;  %v1539_v29 = vsub.f32 %v1468_v6, %v3534_v39 }
 0x303   : > { %v1351_v59 = vpop.xlane.xlu1 %1350  ;;  %2854 = vpow2.f32 %v1571_v55  ;;  %v1438_v5 = vmul.f32 0.2, %v1349_v58  ;;  %vm1406_vm2 = vcmp.gt.f32.partialorder %v1349_v58, 0.0  ;;  %v1540_v12 = vsub.f32 %v1469_v63, %v3534_v39 }
 0x304   : > { %v1575_v18 = vmul.f32 1.442695, %v1539_v29  ;;  %2856 = vpow2.f32 %v1573_v10  ;;  %v1439_v32 = vmul.f32 0.2, %v1351_v59  ;;  %vm1407_vm4 = vcmp.gt.f32.partialorder %v1351_v59, 0.0 }
 0x305   : > { %v1470_v19 = vsel %vm1406_vm2, %v1349_v58, %v1438_v5  ;;  %v1577_v8 = vmul.f32 1.442695, %v1540_v12 }
 0x306   : > { %v1353_v26 = vpop.xlane.xlu0 %1352  ;;  %v1541_v44 = vsub.f32 %v1470_v19, %v3534_v39  ;;  %2858 = vpow2.f32 %v1575_v18  ;;  %v1471_v3 = vsel %vm1407_vm4, %v1351_v59, %v1439_v32  ;;  %v2039_v59 = vld [vmem:[%s4056_s3 + $0x78] sm:$0xff] }
 0x307   : > { %v3595_v7 = vpop.xlane.xlu1 %1354  ;;  %v1440_v41 = vmul.f32 0.2, %v1353_v26  ;;  %2860 = vpow2.f32 %v1577_v8  ;;  %vm1408_vm6 = vcmp.gt.f32.partialorder %v1353_v26, 0.0  ;;  %v1542_v58 = vsub.f32 %v1471_v3, %v3534_v39 }
 0x308   : > { %v2851_v45 = vpop.eup %2850  ;;  %v1579_v53 = vmul.f32 1.442695, %v1541_v44  ;;  %v1441_v63 = vmul.f32 0.2, %v3595_v7  ;;  %vm1409_vm8 = vcmp.gt.f32.partialorder %v3595_v7, 0.0 }
 0x309   : > { %v1639_v11 = vmul.f32 %v2851_v45, %v3543_v0  ;;  %v1472_v55 = vsel %vm1408_vm6, %v1353_v26, %v1440_v41 }
 0x30a   : > { %v1357_v13 = vpop.xlane.xlu0 %1356  ;;  %v1543_v26 = vsub.f32 %v1472_v55, %v3534_v39  ;;  %v1473_v19 = vsel %vm1409_vm8, %v3595_v7, %v1441_v63 }
 0x30b   : > { %vm1410_vm3 = vcmp.gt.f32.partialorder %v1357_v13, 0.0  ;;  %v1442_v14 = vmul.f32 0.2, %v1357_v13  ;;  %1673 = vperm.xlu1 %2844, %v1639_v11   ;;  %v3600_v15 = vpop.xlane.xlu1 %1358  ;;  %v1581_v11 = vmul.f32 1.442695, %v1542_v58 }
 0x30c   : > { %v2853_v23 = vpop.eup %2852  ;;  %vm1411_vm10 = vcmp.gt.f32.partialorder %v3600_v15, 0.0 }
 0x30d   : > { %v1474_v27 = vsel %vm1410_vm3, %v1357_v13, %v1442_v14  ;;  %v1640_v34 = vmul.f32 %v2853_v23, %v3543_v0  ;;  %v2855_v52 = vpop.eup %2854  ;;  %v1443_v14 = vmul.f32 0.2, %v3600_v15 }
 0x30e   : > { %v1545_v36 = vsub.f32 %v1474_v27, %v3534_v39  ;;  %v1361_v37 = vpop.xlane.xlu0 %1360  ;;  %v1641_v6 = vmul.f32 %v2855_v52, %v3543_v0  ;;  %v2857_v45 = vpop.eup %2856 }
 0x30f   : > { %vm1412_vm5 = vcmp.gt.f32.partialorder %v1361_v37, 0.0  ;;  %v1444_v48 = vmul.f32 0.2, %v1361_v37  ;;  %2128 = vperm.xlu1 %2844, %v2038_v24   ;;  %1678 = vperm.xlu0 %2845, %v1640_v34   ;;  %v3614_v2 = vpop.xlane.xlu1 %1362  ;;  %v1642_v18 = vmul.f32 %v2857_v45, %v3543_v0 }
 0x310   : > { %v1587_v42 = vmul.f32 1.442695, %v1545_v36  ;;  %v2859_v24 = vpop.eup %2858  ;;  %v1445_v41 = vmul.f32 0.2, %v3614_v2  ;;  %vm1413_vm12 = vcmp.gt.f32.partialorder %v3614_v2, 0.0 }
 0x311   : > { %v1476_v56 = vsel %vm1412_vm5, %v1361_v37, %v1444_v48  ;;  %v2861_v8 = vpop.eup %2860  ;;  %v1583_v37 = vmul.f32 1.442695, %v1543_v26  ;;  %v1544_v48 = vsub.f32 %v1473_v19, %v3534_v39 }
 0x312   : > { %2862 = vpow2.f32 %v1587_v42  ;;  %v1547_v38 = vsub.f32 %v1476_v56, %v3534_v39  ;;  %v1365_v57 = vpop.xlane.xlu0 %1364  ;;  %v1475_v42 = vsel %vm1411_vm10, %v3600_v15, %v1443_v14  ;;  %v1644_v58 = vmul.f32 %v2861_v8, %v3543_v0 }
 0x313   : > { %vm1414_vm7 = vcmp.gt.f32.partialorder %v1365_v57, 0.0  ;;  %v1446_v54 = vmul.f32 0.2, %v1365_v57  ;;  %2138 = vperm.xlu1 %2844, %v2040_v50   ;;  %2123 = vperm.xlu0 %2845, %v2037_v51   ;;  %v3625_v10 = vpop.xlane.xlu1 %1366  ;;  %v1643_v51 = vmul.f32 %v2859_v24, %v3543_v0  ;;  %v1546_v15 = vsub.f32 %v1475_v42, %v3534_v39 }
 0x314   : > { %v1591_v43 = vmul.f32 1.442695, %v1547_v38  ;;  %vm1415_vm14 = vcmp.gt.f32.partialorder %v3625_v10, 0.0 }
 0x315   : > { %v1478_v62 = vsel %vm1414_vm7, %v1365_v57, %v1446_v54  ;;  %v1585_v54 = vmul.f32 1.442695, %v1544_v48 }
 0x316   : > { %2864 = vpow2.f32 %v1591_v43  ;;  %v1549_v29 = vsub.f32 %v1478_v62, %v3534_v39  ;;  %v1369_v5 = vpop.xlane.xlu0 %1368  ;;  %v1477_v62 = vsel %vm1413_vm12, %v3614_v2, %v1445_v41 }
 0x317   : > { %2866 = vpow2.f32 %v1579_v53  ;;  %vm1416_vm9 = vcmp.gt.f32.partialorder %v1369_v5, 0.0  ;;  %v1448_v12 = vmul.f32 0.2, %v1369_v5  ;;  %1683 = vperm.xlu1 %2844, %v1641_v6   ;;  %2133 = vperm.xlu0 %2845, %v2039_v59   ;;  %v1371_v7 = vpop.xlane.xlu1 %1370  ;;  %v1447_v6 = vmul.f32 0.2, %v3625_v10 }
 0x318   : > { %v1595_v13 = vmul.f32 1.442695, %v1549_v29  ;;  %v1449_v24 = vmul.f32 0.2, %v1371_v7  ;;  %vm1417_vm0 = vcmp.gt.f32.partialorder %v1371_v7, 0.0 }
 0x319   : > { %v1480_v23 = vsel %vm1416_vm9, %v1369_v5, %v1448_v12  ;;  %v1589_v5 = vmul.f32 1.442695, %v1546_v15  ;;  %v1479_v19 = vsel %vm1415_vm14, %v3625_v10, %v1447_v6 }
 0x31a   : > { %2868 = vpow2.f32 %v1595_v13  ;;  %v1551_v32 = vsub.f32 %v1480_v23, %v3534_v39  ;;  %v1373_v27 = vpop.xlane.xlu0 %1372  ;;  %v1548_v13 = vsub.f32 %v1477_v62, %v3534_v39 }
 0x31b   : > { %2870 = vpow2.f32 %v1581_v11  ;;  %vm1418_vm11 = vcmp.gt.f32.partialorder %v1373_v27, 0.0  ;;  %v1450_v34 = vmul.f32 0.2, %v1373_v27  ;;  %1688 = vperm.xlu1 %2844, %v1642_v18   ;;  %v1375_v29 = vpop.xlane.xlu1 %1374 }
 0x31c   : > { %v2863_v36 = vpop.eup %2862  ;;  %v1599_v44 = vmul.f32 1.442695, %v1551_v32  ;;  %vm1419_vm2 = vcmp.gt.f32.partialorder %v1375_v29, 0.0 }
 0x31d   : > { %v1482_v50 = vsel %vm1418_vm11, %v1373_v27, %v1450_v34  ;;  %v1649_v3 = vmul.f32 %v2863_v36, %v3543_v0 }
 0x31e   : > { %2872 = vpow2.f32 %v1599_v44  ;;  %v1553_v56 = vsub.f32 %v1482_v50, %v3534_v39  ;;  %v1377_v52 = vpop.xlane.xlu0 %1376  ;;  %v1550_v44 = vsub.f32 %v1479_v19, %v3534_v39 }
 0x31f   : > { %vm1420_vm13 = vcmp.gt.f32.partialorder %v1377_v52, 0.0  ;;  %v1452_v38 = vmul.f32 0.2, %v1377_v52  ;;  %1693 = vperm.xlu1 %2844, %v1643_v51   ;;  %1723 = vperm.xlu0 %2845, %v1649_v3   ;;  %2874 = vpow2.f32 %v1583_v37  ;;  %v1593_v37 = vmul.f32 1.442695, %v1548_v13  ;;  %v1379_v42 = vpop.xlane.xlu1 %1378 }
 0x320   : > { %v2865_v57 = vpop.eup %2864  ;;  %v1603_v53 = vmul.f32 1.442695, %v1553_v56  ;;  %v1481_v51 = vsel %vm1417_vm0, %v1371_v7, %v1449_v24  ;;  %v1451_v3 = vmul.f32 0.2, %v1375_v29  ;;  %v1597_v15 = vmul.f32 1.442695, %v1550_v44 }
 0x321   : > { %v2867_v43 = vpop.eup %2866  ;;  %v1484_v59 = vsel %vm1420_vm13, %v1377_v52, %v1452_v38  ;;  %v1651_v55 = vmul.f32 %v2865_v57, %v3543_v0  ;;  %v1552_v57 = vsub.f32 %v1481_v51, %v3534_v39  ;;  %v1453_v7 = vmul.f32 0.2, %v1379_v42 }
 0x322   : > { %2876 = vpow2.f32 %v1603_v53  ;;  %v1555_v63 = vsub.f32 %v1484_v59, %v3534_v39  ;;  %v1381_v45 = vpop.xlane.xlu0 %1380  ;;  %v1645_v2 = vmul.f32 %v2867_v43, %v3543_v0  ;;  %vm1421_vm3 = vcmp.gt.f32.partialorder %v1379_v42, 0.0 }
 0x323   : > { %vm1422_vm15 = vcmp.gt.f32.partialorder %v1381_v45, 0.0  ;;  %v1454_v11 = vmul.f32 0.2, %v1381_v45  ;;  %1698 = vperm.xlu1 %2844, %v1644_v58   ;;  %1733 = vperm.xlu0 %2845, %v1651_v55   ;;  %2878 = vpow2.f32 %v1585_v54  ;;  %v1483_v58 = vsel %vm1419_vm2, %v1375_v29, %v1451_v3  ;;  %v1383_v59 = vpop.xlane.xlu1 %1382 }
 0x324   : > { %v2869_v12 = vpop.eup %2868  ;;  %v1607_v26 = vmul.f32 1.442695, %v1555_v63  ;;  %v1601_v62 = vmul.f32 1.442695, %v1552_v57  ;;  %v1554_v6 = vsub.f32 %v1483_v58, %v3534_v39  ;;  %vm1423_vm4 = vcmp.gt.f32.partialorder %v1383_v59, 0.0  ;;  %v2042_v57 = vld [vmem:[%s4056_s3 + $0x90] sm:$0xff] }
 0x325   : > { %v2871_v14 = vpop.eup %2870  ;;  %v1486_v23 = vsel %vm1422_vm15, %v1381_v45, %v1454_v11  ;;  %v1653_v18 = vmul.f32 %v2869_v12, %v3543_v0  ;;  %v1485_v11 = vsel %vm1421_vm3, %v1379_v42, %v1453_v7  ;;  %v1455_v12 = vmul.f32 0.2, %v1383_v59 }
 0x326   : > { %2880 = vpow2.f32 %v1607_v26  ;;  %v1557_v32 = vsub.f32 %v1486_v23, %v3534_v39  ;;  %v1385_v27 = vpop.xlane.xlu0 %1384  ;;  %v1646_v48 = vmul.f32 %v2871_v14, %v3543_v0  ;;  %v1605_v26 = vmul.f32 1.442695, %v1554_v6  ;;  %v2049_v6 = vld [vmem:[%s4056_s3 + $0xc8] sm:$0xff] }
 0x327   : > { %2882 = vpow2.f32 %v1589_v5  ;;  %vm1424_vm1 = vcmp.gt.f32.partialorder %v1385_v27, 0.0  ;;  %v1456_v8 = vmul.f32 0.2, %v1385_v27  ;;  %1703 = vperm.xlu1 %2844, %v1645_v2   ;;  %1743 = vperm.xlu0 %2845, %v1653_v18   ;;  %v1556_v13 = vsub.f32 %v1485_v11, %v3534_v39  ;;  %v3697_v58 = vpop.permute.xlu1 %1798 }
 0x328   : > { %v2873_v34 = vpop.eup %2872  ;;  %v1611_v36 = vmul.f32 1.442695, %v1557_v32  ;;  %v1487_v23 = vsel %vm1423_vm4, %v1383_v59, %v1455_v12  ;;  %v2047_v59 = vld [vmem:[%s4056_s3 + $0xb8] sm:$0xff] }
 0x329   : > { %v1488_v10 = vsel %vm1424_vm1, %v1385_v27, %v1456_v8  ;;  %v1655_v50 = vmul.f32 %v2873_v34, %v3543_v0  ;;  %v2875_v41 = vpop.eup %2874  ;;  %v1609_v24 = vmul.f32 1.442695, %v1556_v13  ;;  %v1558_v32 = vsub.f32 %v1487_v23, %v3534_v39 }
 0x32a   : > { %2884 = vpow2.f32 %v1611_v36  ;;  %v1559_v56 = vsub.f32 %v1488_v10, %v3534_v39  ;;  %v1647_v53 = vmul.f32 %v2875_v41, %v3543_v0  ;;  %v2043_v39 = vld [vmem:[%s4056_s3 + $0x98] sm:$0xff]  ;;  %v2045_v41 = vld [vmem:[%s4056_s3 + $0xa8] sm:$0xff] }
 0x32b   : > { %1708 = vperm.xlu1 %2844, %v1646_v48   ;;  %1753 = vperm.xlu0 %2845, %v1655_v50   ;;  %2886 = vpow2.f32 %v1593_v37  ;;  %v1613_v36 = vmul.f32 1.442695, %v1558_v32  ;;  %v2041_v37 = vld [vmem:[%s4056_s3 + $0x88] sm:$0xff]  ;;  %v2044_v50 = vld [vmem:[%s4056_s3 + $0xa0] sm:$0xff]  ;;  %v3704_v7 = vpop.permute.xlu1 %1808 }
 0x32c   : > { %v2877_v52 = vpop.eup %2876  ;;  %v1615_v38 = vmul.f32 1.442695, %v1559_v56 }
 0x32d   : > { %v1657_v54 = vmul.f32 %v2877_v52, %v3543_v0  ;;  %v2879_v43 = vpop.eup %2878 }
 0x32e   : > { %2888 = vpow2.f32 %v1615_v38  ;;  %v1648_v45 = vmul.f32 %v2879_v43, %v3543_v0  ;;  %v2046_v38 = vld [vmem:[%s4056_s3 + $0xb0] sm:$0xff] }
 0x32f   : > { %1713 = vperm.xlu1 %2844, %v1647_v53   ;;  %1763 = vperm.xlu0 %2845, %v1657_v54   ;;  %2890 = vpow2.f32 %v1597_v15  ;;  %v2048_v53 = vld [vmem:[%s4056_s3 + $0xc0] sm:$0xff]  ;;  %v2050_v54 = vld [vmem:[%s4056_s3 + $0xd0] sm:$0xff] }
 0x330   : > { %v2881_v55 = vpop.eup %2880  ;;  %2892 = vpow2.f32 %v1601_v62  ;;  %v2054_v43 = vld [vmem:[%s4056_s3 + $0xf0] sm:$0xff]  ;;  %v3715_v62 = vpop.permute.xlu1 %2058 }
 0x331   : > { %v2883_v63 = vpop.eup %2882  ;;  %v1659_v5 = vmul.f32 %v2881_v55, %v3543_v0  ;;  %2894 = vpow2.f32 %v1605_v26  ;;  %v3713_v55 = vpop.permute.xlu0 %1803 }
 0x332   : > { %v1650_v2 = vmul.f32 %v2883_v63, %v3543_v0  ;;  %2896 = vpow2.f32 %v1609_v24 }
 0x333   : > { %1718 = vperm.xlu1 %2844, %v1648_v45   ;;  %1773 = vperm.xlu0 %2845, %v1659_v5   ;;  %2898 = vpow2.f32 %v1613_v36  ;;  %v2053_v5 = vld [vmem:[%s4056_s3 + $0xe8] sm:$0xff] }
 0x334   : > { %v2885_v29 = vpop.eup %2884  ;;  %v3722_v45 = vpop.permute.xlu1 %2068 }
 0x335   : > { %v1661_v14 = vmul.f32 %v2885_v29, %v3543_v0  ;;  %v2887_v18 = vpop.eup %2886  ;;  %v3720_v63 = vpop.permute.xlu0 %1813  ;;  %v2055_v29 = vld [vmem:[%s4056_s3 + $0xf8] sm:$0xff] }
 0x336   : > { %v1652_v27 = vmul.f32 %v2887_v18, %v3543_v0 }
 0x337   : > { %1728 = vperm.xlu1 %2844, %v1650_v2   ;;  %1783 = vperm.xlu0 %2845, %v1661_v14  }
 0x338   : > { %v2889_v19 = vpop.eup %2888  ;;  %v3732_v12 = vpop.permute.xlu1 %2078 }
 0x339   : > { %v1663_v8 = vmul.f32 %v2889_v19, %v3543_v0  ;;  %v2891_v34 = vpop.eup %2890  ;;  %v3730_v11 = vpop.permute.xlu0 %2063 }
 0x33a   : > { %v1654_v44 = vmul.f32 %v2891_v34, %v3543_v0  ;;  %v2893_v48 = vpop.eup %2892 }
 0x33b   : > { %1738 = vperm.xlu1 %2844, %v1652_v27   ;;  %1793 = vperm.xlu0 %2845, %v1663_v8   ;;  %v1656_v42 = vmul.f32 %v2893_v48, %v3543_v0  ;;  %v2895_v10 = vpop.eup %2894 }
 0x33c   : > { %v1658_v51 = vmul.f32 %v2895_v10, %v3543_v0  ;;  %v2897_v3 = vpop.eup %2896  ;;  %v3739_v13 = vpop.permute.xlu1 %2088 }
 0x33d   : > { %v1660_v56 = vmul.f32 %v2897_v3, %v3543_v0  ;;  %v2899_v52 = vpop.eup %2898  ;;  %v3737_v26 = vpop.permute.xlu0 %2073 }
 0x33e   : > { %v1662_v15 = vmul.f32 %v2899_v52, %v3543_v0  ;;  %v2052_v0 = vld [vmem:[%s4056_s3 + $0xe0] sm:$0xff] }
 0x33f   : > { %1748 = vperm.xlu1 %2844, %v1654_v44   ;;  %2143 = vperm.xlu0 %2845, %v2041_v37  }
 0x340   : > { %v3743_v14 = vpop.permute.xlu1 %2098 }
 0x341   : > { %v3741_v2 = vpop.permute.xlu0 %2083 }
 0x343   : > { %1758 = vperm.xlu1 %2844, %v1656_v42   ;;  %2153 = vperm.xlu0 %2845, %v2043_v39  }
 0x344   : > { %v3747_v18 = vpop.permute.xlu1 %2108 }
 0x345   : > { %v3745_v23 = vpop.permute.xlu0 %2093 }
 0x347   : > { %1768 = vperm.xlu1 %2844, %v1658_v51   ;;  %2158 = vperm.xlu0 %2845, %v2044_v50  }
 0x348   : > { %v3751_v24 = vpop.permute.xlu1 %2118 }
 0x349   : > { %v3749_v19 = vpop.permute.xlu0 %2103 }
 0x34b   : > { %1778 = vperm.xlu1 %2844, %v1660_v56   ;;  %2163 = vperm.xlu0 %2845, %v2045_v41  }
 0x34d   : > { %v3753_v32 = vpop.permute.xlu0 %2113 }
 0x34f   : > { %1788 = vperm.xlu1 %2844, %v1662_v15   ;;  %2168 = vperm.xlu0 %2845, %v2046_v38  }
 0x353   : > { %2148 = vperm.xlu1 %2844, %v2042_v57   ;;  %2178 = vperm.xlu0 %2845, %v2048_v53  }
 0x357   : > { %1818 = vperm.xlu1 %2844, %v3546_v1   ;;  %2188 = vperm.xlu0 %2845, %v2050_v54  }
 0x35b   : > { %1823 = vperm.xlu1 %2844, %v3546_v1   ;;  %2198 = vperm.xlu0 %2845, %v2052_v0  }
 0x35f   : > { %1828 = vperm.xlu1 %2844, %v3546_v1   ;;  %2208 = vperm.xlu0 %2845, %v2054_v43   ;;  %v2051_v1 = vld [vmem:[%s4056_s3 + $0xd8] sm:$0xff] }
 0x363   : > { %2173 = vperm.xlu1 %2844, %v2047_v59  }
 0x367   : > { %2183 = vperm.xlu1 %2844, %v2049_v6  }
 0x36b   : > { %2193 = vperm.xlu1 %2844, %v2051_v1  }
 0x36f   : > { %2203 = vperm.xlu1 %2844, %v2053_v5  }
 0x373   : > { %2213 = vperm.xlu1 %2844, %v2055_v29  }
 0x38a   : > { %v1674_v27 = vpop.permute.xlu1 %1673 }
 0x38b   : > { %v1831_v39 = vmul.f32 %v1674_v27, %v3453_v25 }
 0x38d   : > { %v1895_v41 = vmul.f32 1.442695, %v1831_v39  ;;  %vm1863_vm6 = vcmp.gt.f32.partialorder %v1831_v39, 0.0 }
 0x38e   : > { %v3755_v8 = vpop.permute.xlu1 %2128  ;;  %v1679_v34 = vpop.permute.xlu0 %1678 }
 0x38f   : > { %v1832_v44 = vmul.f32 %v1679_v34, %v3460_v31 }
 0x391   : > { %v1897_v10 = vmul.f32 1.442695, %v1832_v44  ;;  %vm1864_vm5 = vcmp.gt.f32.partialorder %v1832_v44, 0.0 }
 0x392   : > { %v3757_v36 = vpop.permute.xlu1 %2138  ;;  %v3759_v37 = vpop.permute.xlu0 %2123 }
 0x393   : > { %2900 = vpow2.f32 %v1897_v10 }
 0x394   : > { %2902 = vpow2.f32 %v1895_v41 }
 0x396   : > { %v1684_v48 = vpop.permute.xlu1 %1683  ;;  %v3764_v50 = vpop.permute.xlu0 %2133 }
 0x397   : > { %v1833_v42 = vmul.f32 %v1684_v48, %v3464_v60 }
 0x399   : > { %v1899_v56 = vmul.f32 1.442695, %v1833_v42  ;;  %vm1865_vm7 = vcmp.gt.f32.partialorder %v1833_v42, 0.0 }
 0x39a   : > { %v1689_v51 = vpop.permute.xlu1 %1688 }
 0x39b   : > { %v3767_v3 = vmul.f32 %v1689_v51, %v3468_v46  ;;  %2904 = vpow2.f32 %v1899_v56 }
 0x39d   : > { %v1901_v15 = vmul.f32 1.442695, %v3767_v3  ;;  %vm1866_vm8 = vcmp.gt.f32.partialorder %v3767_v3, 0.0 }
 0x39e   : > { %v1694_v52 = vpop.permute.xlu1 %1693  ;;  %v1724_v38 = vpop.permute.xlu0 %1723 }
 0x39f   : > { %v3771_v31 = vmul.f32 %v1694_v52, %v3472_v61  ;;  %2906 = vpow2.f32 %v1901_v15  ;;  %v2901_v61 = vpop.eup %2900  ;;  %v3782_v59 = vmul.f32 %v1724_v38, %v3496_v20 }
 0x3a0   : > { %v2903_v1 = vpop.eup %2902  ;;  %v2514_v34 = vadd.f32 -1.0, %v2901_v61 }
 0x3a1   : > { %v1903_v25 = vmul.f32 1.442695, %v3771_v31  ;;  %v2513_v10 = vadd.f32 -1.0, %v2903_v1  ;;  %v1915_v51 = vmul.f32 1.442695, %v3782_v59  ;;  %vm1867_vm9 = vcmp.gt.f32.partialorder %v3771_v31, 0.0 }
 0x3a2   : > { %v1699_v60 = vpop.permute.xlu1 %1698  ;;  %v1734_v57 = vpop.permute.xlu0 %1733  ;;  %v1992_v15 = vsel %vm1864_vm5, %v1832_v44, %v2514_v34  ;;  %vm1873_vm14 = vcmp.gt.f32.partialorder %v3782_v59, 0.0 }
 0x3a3   : > { %v3775_v46 = vmul.f32 %v1699_v60, %v3476_v30  ;;  %2908 = vpow2.f32 %v1903_v25  ;;  %v3786_v5 = vmul.f32 %v1734_v57, %v3504_v22  ;;  %v1991_v57 = vsel %vm1863_vm6, %v1831_v39, %v2513_v10 }
 0x3a4   : > { %v2217_v61 = vmul.f32 %v3730_v11, %v1992_v15  ;;  %v2216_v39 = vmul.f32 %v3715_v62, %v1991_v57 }
 0x3a5   : > { %v1905_v53 = vmul.f32 1.442695, %v3775_v46  ;;  %v2905_v27 = vpop.eup %2904  ;;  %v1919_v56 = vmul.f32 1.442695, %v3786_v5  ;;  %vm1868_vm10 = vcmp.gt.f32.partialorder %v3775_v46, 0.0  ;;  %vm1875_vm15 = vcmp.gt.f32.partialorder %v3786_v5, 0.0 }
 0x3a6   : > { %v1704_v54 = vpop.permute.xlu1 %1703  ;;  %v1744_v0 = vpop.permute.xlu0 %1743  ;;  %v2515_v41 = vadd.f32 -1.0, %v2905_v27 }
 0x3a7   : > { %2910 = vpow2.f32 %v1905_v53  ;;  %v3779_v43 = vmul.f32 %v1704_v54, %v3480_v47  ;;  %v3798_v53 = vmul.f32 %v1744_v0, %v3512_v33 }
 0x3a9   : > { %v1907_v6 = vmul.f32 1.442695, %v3779_v43  ;;  %v2907_v47 = vpop.eup %2906  ;;  %vm1869_vm11 = vcmp.gt.f32.partialorder %v3779_v43, 0.0  ;;  %vm1877_vm2 = vcmp.gt.f32.partialorder %v3798_v53, 0.0 }
 0x3aa   : > { %v1709_v30 = vpop.permute.xlu1 %1708  ;;  %v1754_v29 = vpop.permute.xlu0 %1753 }
 0x3ab   : > { %2912 = vpow2.f32 %v1907_v6  ;;  %v3789_v48 = vmul.f32 %v1709_v30, %v3484_v16  ;;  %v2516_v16 = vadd.f32 -1.0, %v2907_v47  ;;  %v1993_v6 = vsel %vm1865_vm7, %v1833_v42, %v2515_v41 }
 0x3ac   : > { %v2218_v11 = vmul.f32 %v3722_v45, %v1993_v6  ;;  %v1923_v42 = vmul.f32 1.442695, %v3798_v53  ;;  %v2248_v47 = vadd.f32 %v2217_v61, %v2216_v39 }
 0x3ad   : > { %v1909_v20 = vmul.f32 1.442695, %v3789_v48  ;;  %v2909_v38 = vpop.eup %2908  ;;  %v1994_v33 = vsel %vm1866_vm8, %v3767_v3, %v2516_v16  ;;  %vm1870_vm12 = vcmp.gt.f32.partialorder %v3789_v48, 0.0 }
 0x3ae   : > { %v1714_v22 = vpop.permute.xlu1 %1713  ;;  %v1764_v52 = vpop.permute.xlu0 %1763  ;;  %v2517_v1 = vadd.f32 -1.0, %v2909_v38  ;;  %v2219_v3 = vmul.f32 %v3737_v26, %v1994_v33 }
 0x3af   : > { %2914 = vpow2.f32 %v1909_v20  ;;  %v3795_v25 = vmul.f32 %v1714_v22, %v3488_v17 }
 0x3b0   : > { %2916 = vpow2.f32 %v1915_v51  ;;  %v1995_v10 = vsel %vm1867_vm9, %v3771_v31, %v2517_v1 }
 0x3b1   : > { %v2911_v60 = vpop.eup %2910  ;;  %v1911_v54 = vmul.f32 1.442695, %v3795_v25  ;;  %2918 = vpow2.f32 %v1919_v56  ;;  %v2249_v56 = vadd.f32 %v2248_v47, %v2218_v11  ;;  %vm1871_vm13 = vcmp.gt.f32.partialorder %v3795_v25, 0.0 }
 0x3b2   : > { %v1719_v44 = vpop.permute.xlu1 %1718  ;;  %v3802_v30 = vpop.permute.xlu0 %1773  ;;  %v2518_v0 = vadd.f32 -1.0, %v2911_v60 }
 0x3b3   : > { %2920 = vpow2.f32 %v1911_v54  ;;  %v3806_v17 = vmul.f32 %v1719_v44, %v3492_v4  ;;  %v3816_v4 = vmul.f32 %v1754_v29, %v3520_v9  ;;  %v2220_v9 = vmul.f32 %v3732_v12, %v1995_v10 }
 0x3b4   : > { %v1996_v41 = vsel %vm1868_vm10, %v3775_v46, %v2518_v0  ;;  %v2250_v16 = vadd.f32 %v2249_v56, %v2219_v3  ;;  %v2964_v3 = vld [vmem:[#allocation5 + $0x88] sm:$0xff] }
 0x3b5   : > { %v2913_v27 = vpop.eup %2912  ;;  %v1913_v34 = vmul.f32 1.442695, %v3806_v17  ;;  %v1927_v38 = vmul.f32 1.442695, %v3816_v4  ;;  %v2221_v60 = vmul.f32 %v3741_v2, %v1996_v41  ;;  %vm1872_vm0 = vcmp.gt.f32.partialorder %v3806_v17, 0.0 }
 0x3b6   : > { %v2519_v51 = vadd.f32 -1.0, %v2913_v27  ;;  %v1729_v62 = vpop.permute.xlu1 %1728  ;;  %v3818_v20 = vpop.permute.xlu0 %1783  ;;  %v2251_v6 = vadd.f32 %v2250_v16, %v2220_v9  ;;  %vm1879_vm4 = vcmp.gt.f32.partialorder %v3816_v4, 0.0 }
 0x3b7   : > { %2922 = vpow2.f32 %v1913_v34  ;;  %v3823_v45 = vmul.f32 %v1729_v62, %v3500_v21 }
 0x3b8   : > { %2924 = vpow2.f32 %v1923_v42  ;;  %v1997_v22 = vsel %vm1869_vm11, %v3779_v43, %v2519_v51  ;;  %v3840_v43 = vmul.f32 %v1764_v52, %v3526_v49 }
 0x3b9   : > { %v2915_v31 = vpop.eup %2914  ;;  %v1917_v29 = vmul.f32 1.442695, %v3823_v45  ;;  %v2222_v1 = vmul.f32 %v3739_v13, %v1997_v22  ;;  %vm1874_vm1 = vcmp.gt.f32.partialorder %v3823_v45, 0.0 }
 0x3ba   : > { %v2520_v26 = vadd.f32 -1.0, %v2915_v31  ;;  %v1739_v21 = vpop.permute.xlu1 %1738  ;;  %v3832_v15 = vpop.permute.xlu0 %1793  ;;  %v1931_v52 = vmul.f32 1.442695, %v3840_v43  ;;  %vm1881_vm7 = vcmp.gt.f32.partialorder %v3840_v43, 0.0 }
 0x3bb   : > { %v2917_v46 = vpop.eup %2916  ;;  %2926 = vpow2.f32 %v1917_v29  ;;  %v3836_v12 = vmul.f32 %v1739_v21, %v3508_v28  ;;  %v2252_v28 = vadd.f32 %v2251_v6, %v2221_v60 }
 0x3bc   : > { %v2919_v57 = vpop.eup %2918  ;;  %v1998_v54 = vsel %vm1870_vm12, %v3789_v48, %v2520_v26  ;;  %v2523_v39 = vadd.f32 -1.0, %v2917_v46  ;;  %2928 = vpow2.f32 %v1927_v38  ;;  %v2965_v38 = vld [vmem:[#allocation5 + $0xb0] sm:$0xff] }
 0x3bd   : > { %v2921_v61 = vpop.eup %2920  ;;  %v1921_v44 = vmul.f32 1.442695, %v3836_v12  ;;  %v2223_v0 = vmul.f32 %v3745_v23, %v1998_v54  ;;  %v2525_v49 = vadd.f32 -1.0, %v2919_v57  ;;  %v2253_v42 = vadd.f32 %v2252_v28, %v2222_v1  ;;  %v2967_v28 = vld [vmem:[#allocation5 + $0xc0] sm:$0xff] }
 0x3be   : > { %v2521_v2 = vadd.f32 -1.0, %v2921_v61  ;;  %v1749_v33 = vpop.permute.xlu1 %1748  ;;  %v3852_v27 = vpop.permute.xlu0 %2143  ;;  %v3857_v23 = vmul.f32 %v3802_v30, %v3531_v40  ;;  %v2001_v47 = vsel %vm1873_vm14, %v3782_v59, %v2523_v39  ;;  %v3872_v21 = vmul.f32 %v2965_v38, %v3818_v20  ;;  %v1290_v20 = vld [vmem:[#allocation5 + $0xc8] sm:$0xff]  ;;  %v1291_v61 = vld [vmem:[#allocation5 + $0xd0] sm:$0xff] }
 0x3bf   : > { %2930 = vpow2.f32 %v1921_v44  ;;  %v3847_v48 = vmul.f32 %v1749_v33, %v3516_v35  ;;  %v2254_v62 = vadd.f32 %v2253_v42, %v2223_v0  ;;  %v2226_v29 = vmul.f32 %v3747_v18, %v2001_v47 }
 0x3c0   : > { %v1999_v13 = vsel %vm1871_vm13, %v3795_v25, %v2521_v2  ;;  %v1935_v56 = vmul.f32 1.442695, %v3857_v23  ;;  %v1939_v2 = vmul.f32 1.442695, %v3872_v21  ;;  %vm1876_vm3 = vcmp.gt.f32.partialorder %v3836_v12, 0.0 }
 0x3c1   : > { %v2923_v11 = vpop.eup %2922  ;;  %v2224_v34 = vmul.f32 %v3743_v14, %v1999_v13  ;;  %v1925_v35 = vmul.f32 1.442695, %v3847_v48  ;;  %v2003_v14 = vsel %vm1875_vm15, %v3786_v5, %v2525_v49  ;;  %v2968_v49 = vld [vmem:[#allocation5 + $0xa8] sm:$0xff]  ;;  %vm1878_vm5 = vcmp.gt.f32.partialorder %v3847_v48, 0.0 }
 0x3c2   : > { %v2522_v10 = vadd.f32 -1.0, %v2923_v11  ;;  %v1759_v25 = vpop.permute.xlu1 %1758  ;;  %v2925_v51 = vpop.eup %2924  ;;  %v2228_v57 = vmul.f32 %v3751_v24, %v2003_v14  ;;  %v3887_v24 = vmul.f32 %v2967_v28, %v3832_v15  ;;  %v2969_v14 = vld [vmem:[#allocation5 + $0xb8] sm:$0xff]  ;;  %v1295_v28 = vld [vmem:[#allocation5 + $0xf0] sm:$0xff]  ;;  %vm1883_vm9 = vcmp.gt.f32.partialorder %v3857_v23, 0.0 }
 0x3c3   : > { %2932 = vpow2.f32 %v1925_v35  ;;  %v3863_v41 = vmul.f32 %v2964_v3, %v1759_v25  ;;  %v2255_v31 = vadd.f32 %v2254_v62, %v2224_v34  ;;  %v2527_v22 = vadd.f32 -1.0, %v2925_v51  ;;  %v3874_v5 = vpop.permute.xlu0 %2153  ;;  %v1292_v34 = vld [vmem:[#allocation5 + $0xd8] sm:$0xff] }
 0x3c4   : > { %2934 = vpow2.f32 %v1931_v52  ;;  %v2000_v40 = vsel %vm1872_vm0, %v3806_v17, %v2522_v10  ;;  %vm1885_vm11 = vcmp.gt.f32.partialorder %v3872_v21, 0.0  ;;  %vm1887_vm14 = vcmp.gt.f32.partialorder %v3887_v24, 0.0 }
 0x3c5   : > { %v2927_v30 = vpop.eup %2926  ;;  %v2225_v59 = vmul.f32 %v3749_v19, %v2000_v40  ;;  %v1929_v9 = vmul.f32 1.442695, %v3863_v41  ;;  %v2966_v19 = vld [vmem:[#allocation5 + $0x98] sm:$0xff]  ;;  %v2005_v39 = vsel %vm1877_vm2, %v3798_v53, %v2527_v22  ;;  %v3896_v53 = vmul.f32 %v3713_v55, %v1291_v61 }
 0x3c6   : > { %v2524_v26 = vadd.f32 -1.0, %v2927_v30  ;;  %v1769_v46 = vpop.permute.xlu1 %1768  ;;  %v2929_v60 = vpop.eup %2928  ;;  %v1943_v55 = vmul.f32 1.442695, %v3887_v24  ;;  %v3911_v30 = vmul.f32 %v3704_v7, %v1292_v34  ;;  %vm1880_vm6 = vcmp.gt.f32.partialorder %v3863_v41, 0.0 }
 0x3c7   : > { %v2256_v17 = vadd.f32 %v2255_v31, %v2225_v59  ;;  %2936 = vpow2.f32 %v1929_v9  ;;  %v3877_v16 = vmul.f32 %v2966_v19, %v1769_v46  ;;  %v2529_v52 = vadd.f32 -1.0, %v2929_v60  ;;  %v3899_v42 = vpop.permute.xlu0 %2158 }
 0x3c8   : > { %v2002_v18 = vsel %vm1874_vm1, %v3823_v45, %v2524_v26  ;;  %2938 = vpow2.f32 %v1935_v56  ;;  %v1947_v56 = vmul.f32 1.442695, %v3896_v53  ;;  %vm1889_vm15 = vcmp.gt.f32.partialorder %v3896_v53, 0.0 }
 0x3c9   : > { %v2931_v54 = vpop.eup %2930  ;;  %v2227_v6 = vmul.f32 %v3753_v32, %v2002_v18  ;;  %v2257_v1 = vadd.f32 %v2256_v17, %v2226_v29  ;;  %v1933_v44 = vmul.f32 1.442695, %v3877_v16  ;;  %v3893_v32 = vmul.f32 %v3697_v58, %v1290_v20 }
 0x3ca   : > { %v2526_v33 = vadd.f32 -1.0, %v2931_v54  ;;  %v1779_v0 = vpop.permute.xlu1 %1778  ;;  %v2230_v58 = vmul.f32 %v3755_v8, %v2005_v39  ;;  %v2007_v8 = vsel %vm1879_vm4, %v3816_v4, %v2529_v52  ;;  %vm1882_vm8 = vcmp.gt.f32.partialorder %v3877_v16, 0.0 }
 0x3cb   : > { %v2258_v45 = vadd.f32 %v2257_v1, %v2227_v6  ;;  %2940 = vpow2.f32 %v1933_v44  ;;  %v3890_v13 = vmul.f32 %v2968_v49, %v1779_v0  ;;  %v2164_v38 = vpop.permute.xlu0 %2163  ;;  %v2232_v4 = vmul.f32 %v3757_v36, %v2007_v8 }
 0x3cc   : > { %v2004_v11 = vsel %vm1876_vm3, %v3836_v12, %v2526_v33  ;;  %2942 = vpow2.f32 %v1939_v2  ;;  %v1293_v12 = vld [vmem:[#allocation5 + $0xe0] sm:$0xff]  ;;  %vm1888_vm13 = vcmp.gt.f32.partialorder %v3893_v32, 0.0  ;;  %vm1890_vm0 = vcmp.gt.f32.partialorder %v3911_v30, 0.0 }
 0x3cd   : > { %v2933_v15 = vpop.eup %2932  ;;  %v2229_v35 = vmul.f32 %v3759_v37, %v2004_v11  ;;  %v2259_v47 = vadd.f32 %v2258_v45, %v2228_v57  ;;  %v1937_v10 = vmul.f32 1.442695, %v3890_v13  ;;  %v1945_v37 = vmul.f32 1.442695, %v3893_v32  ;;  %v1294_v57 = vld [vmem:[#allocation5 + $0xe8] sm:$0xff] }
 0x3ce   : > { %v2935_v25 = vpop.eup %2934  ;;  %v2528_v51 = vadd.f32 -1.0, %v2933_v15  ;;  %v1789_v62 = vpop.permute.xlu1 %1788  ;;  %v3921_v26 = vmul.f32 %v3720_v63, %v1293_v12  ;;  %vm1884_vm10 = vcmp.gt.f32.partialorder %v3890_v13, 0.0 }
 0x3cf   : > { %v2260_v3 = vadd.f32 %v2259_v47, %v2229_v35  ;;  %2944 = vpow2.f32 %v1937_v10  ;;  %v3907_v40 = vmul.f32 %v2969_v14, %v1789_v62  ;;  %v2531_v17 = vadd.f32 -1.0, %v2935_v25  ;;  %v2169_v33 = vpop.permute.xlu0 %2168  ;;  %v1296_v25 = vld [vmem:[#allocation5 + $0xf8] sm:$0xff] }
 0x3d0   : > { %v2006_v31 = vsel %vm1878_vm5, %v3847_v48, %v2528_v51  ;;  %2946 = vpow2.f32 %v1943_v55  ;;  %v1951_v20 = vmul.f32 1.442695, %v3921_v26  ;;  %vm1891_vm1 = vcmp.gt.f32.partialorder %v3921_v26, 0.0 }
 0x3d1   : > { %v2937_v59 = vpop.eup %2936  ;;  %v2231_v9 = vmul.f32 %v3764_v50, %v2006_v31  ;;  %v2261_v29 = vadd.f32 %v2260_v3, %v2230_v58  ;;  %v1941_v22 = vmul.f32 1.442695, %v3907_v40  ;;  %v1949_v50 = vmul.f32 1.442695, %v3911_v30 }
 0x3d2   : > { %v2530_v7 = vadd.f32 -1.0, %v2937_v59  ;;  %v2149_v46 = vpop.permute.xlu1 %2148  ;;  %v2939_v19 = vpop.eup %2938  ;;  %v2009_v6 = vsel %vm1881_vm7, %v3840_v43, %v2531_v17  ;;  %vm1886_vm12 = vcmp.gt.f32.partialorder %v3907_v40, 0.0 }
 0x3d3   : > { %v2262_v48 = vadd.f32 %v2261_v29, %v2231_v9  ;;  %2948 = vpow2.f32 %v1941_v22  ;;  %v2533_v61 = vadd.f32 -1.0, %v2939_v19  ;;  %v2234_v44 = vmul.f32 %v2149_v46, %v2009_v6  ;;  %v2179_v12 = vpop.permute.xlu0 %2178 }
 0x3d4   : > { %2950 = vpow2.f32 %v1945_v37  ;;  %v2008_v60 = vsel %vm1880_vm6, %v3863_v41, %v2530_v7 }
 0x3d5   : > { %v2941_v63 = vpop.eup %2940  ;;  %2952 = vpow2.f32 %v1947_v56  ;;  %v2233_v18 = vmul.f32 %v3852_v27, %v2008_v60  ;;  %v2263_v54 = vadd.f32 %v2262_v48, %v2232_v4  ;;  %v2011_v52 = vsel %vm1883_vm9, %v3857_v23, %v2533_v61 }
 0x3d6   : > { %v2532_v36 = vadd.f32 -1.0, %v2941_v63  ;;  %v1819_v1 = vpop.permute.xlu1 %1818  ;;  %v2943_v2 = vpop.eup %2942  ;;  %2954 = vpow2.f32 %v1949_v50  ;;  %v2236_v34 = vmul.f32 %v3899_v42, %v2011_v52 }
 0x3d7   : > { %v2264_v39 = vadd.f32 %v2263_v54, %v2233_v18  ;;  %v3932_v41 = vmul.f32 %v1819_v1, %v1294_v57  ;;  %2956 = vpow2.f32 %v1951_v20  ;;  %v2535_v10 = vadd.f32 -1.0, %v2943_v2  ;;  %v2189_v4 = vpop.permute.xlu0 %2188 }
 0x3d8   : > { %v2010_v27 = vsel %vm1882_vm8, %v3877_v16, %v2532_v36 }
 0x3d9   : > { %v2945_v0 = vpop.eup %2944  ;;  %v2235_v45 = vmul.f32 %v3874_v5, %v2010_v27  ;;  %v2265_v49 = vadd.f32 %v2264_v39, %v2234_v44  ;;  %v1953_v43 = vmul.f32 1.442695, %v3932_v41  ;;  %vm1892_vm3 = vcmp.gt.f32.partialorder %v3932_v41, 0.0 }
 0x3da   : > { %v2534_v11 = vadd.f32 -1.0, %v2945_v0  ;;  %v1824_v15 = vpop.permute.xlu1 %1823  ;;  %v2947_v47 = vpop.eup %2946 }
 0x3db   : > { %v2266_v16 = vadd.f32 %v2265_v49, %v2235_v45  ;;  %v3941_v35 = vmul.f32 %v1824_v15, %v1295_v28  ;;  %2958 = vpow2.f32 %v1953_v43  ;;  %v2537_v31 = vadd.f32 -1.0, %v2947_v47  ;;  %v2199_v1 = vpop.permute.xlu0 %2198 }
 0x3dc   : > { %v2012_v5 = vsel %vm1884_vm10, %v3890_v13, %v2534_v11  ;;  %v2013_v13 = vsel %vm1885_vm11, %v3872_v21, %v2535_v10 }
 0x3dd   : > { %v2949_v58 = vpop.eup %2948  ;;  %v2237_v55 = vmul.f32 %v2164_v38, %v2012_v5  ;;  %v2267_v51 = vadd.f32 %v2266_v16, %v2236_v34  ;;  %v1955_v23 = vmul.f32 1.442695, %v3941_v35  ;;  %v2238_v59 = vmul.f32 %v2169_v33, %v2013_v13 }
 0x3de   : > { %v2951_v62 = vpop.eup %2950  ;;  %v1829_v3 = vpop.permute.xlu1 %1828  ;;  %v2536_v42 = vadd.f32 -1.0, %v2949_v58  ;;  %v2015_v21 = vsel %vm1887_vm14, %v3887_v24, %v2537_v31  ;;  %vm1893_vm2 = vcmp.gt.f32.partialorder %v3941_v35, 0.0 }
 0x3df   : > { %v2953_v14 = vpop.eup %2952  ;;  %2960 = vpow2.f32 %v1955_v23  ;;  %v1862_v37 = vmul.f32 %v1829_v3, %v1296_v25  ;;  %v2268_v8 = vadd.f32 %v2267_v51, %v2237_v55  ;;  %v2538_v7 = vadd.f32 -1.0, %v2951_v62  ;;  %v2209_v34 = vpop.permute.xlu0 %2208 }
 0x3e0   : > { %v2955_v9 = vpop.eup %2954  ;;  %v2014_v29 = vsel %vm1886_vm12, %v3907_v40, %v2536_v42  ;;  %v2539_v19 = vadd.f32 -1.0, %v2953_v14  ;;  %v2240_v48 = vmul.f32 %v2179_v12, %v2015_v21  ;;  %v2023_v12 = vld [vmem:[#allocation4] sm:$0x1] }
 0x3e1   : > { %v1957_v56 = vmul.f32 1.442695, %v1862_v37  ;;  %v2269_v46 = vadd.f32 %v2268_v8, %v2238_v59  ;;  %v2957_v17 = vpop.eup %2956  ;;  %v2016_v40 = vsel %vm1888_vm13, %v3893_v32, %v2538_v7  ;;  %v2540_v57 = vadd.f32 -1.0, %v2955_v9 }
 0x3e2   : > { %v2174_v22 = vpop.permute.xlu1 %2173  ;;  %v2017_v20 = vsel %vm1889_vm15, %v3896_v53, %v2539_v19  ;;  %v2541_v36 = vadd.f32 -1.0, %v2957_v17  ;;  %vm1894_vm4 = vcmp.gt.f32.partialorder %v1862_v37, 0.0 }
 0x3e3   : > { %2962 = vpow2.f32 %v1957_v56  ;;  %v2239_v38 = vmul.f32 %v2174_v22, %v2014_v29  ;;  %v2242_v24 = vmul.f32 %v2189_v4, %v2017_v20  ;;  %v2018_v39 = vsel %vm1890_vm0, %v3911_v30, %v2540_v57 }
 0x3e4   : > { %v2019_v28 = vsel %vm1891_vm1, %v3921_v26, %v2541_v36 }
 0x3e5   : > { %v2270_v50 = vadd.f32 %v2269_v46, %v2239_v38  ;;  %v2959_v63 = vpop.eup %2958  ;;  %v2244_v45 = vmul.f32 %v2199_v1, %v2019_v28 }
 0x3e6   : > { %v2184_v60 = vpop.permute.xlu1 %2183  ;;  %v2542_v2 = vadd.f32 -1.0, %v2959_v63 }
 0x3e7   : > { %v2241_v18 = vmul.f32 %v2184_v60, %v2016_v40  ;;  %v2271_v54 = vadd.f32 %v2270_v50, %v2240_v48 }
 0x3e8   : > { %v2020_v43 = vsel %vm1892_vm3, %v3932_v41, %v2542_v2 }
 0x3e9   : > { %v2961_v61 = vpop.eup %2960  ;;  %v2272_v6 = vadd.f32 %v2271_v54, %v2241_v18 }
 0x3ea   : > { %v2543_v44 = vadd.f32 -1.0, %v2961_v61  ;;  %v2194_v32 = vpop.permute.xlu1 %2193 }
 0x3eb   : > { %v2243_v27 = vmul.f32 %v2194_v32, %v2018_v39  ;;  %v2273_v33 = vadd.f32 %v2272_v6, %v2242_v24 }
 0x3ec   : > { %v2021_v49 = vsel %vm1893_vm2, %v3941_v35, %v2543_v44 }
 0x3ed   : > { %v2963_v0 = vpop.eup %2962  ;;  %v2274_v53 = vadd.f32 %v2273_v33, %v2243_v27  ;;  %v2246_v16 = vmul.f32 %v2209_v34, %v2021_v49 }
 0x3ee   : > { %v2204_v52 = vpop.permute.xlu1 %2203  ;;  %v2544_v11 = vadd.f32 -1.0, %v2963_v0 }
 0x3ef   : > { %v2245_v30 = vmul.f32 %v2204_v52, %v2020_v43  ;;  %v2275_v15 = vadd.f32 %v2274_v53, %v2244_v45 }
 0x3f0   : > { %v2022_v26 = vsel %vm1894_vm4, %v1862_v37, %v2544_v11 }
 0x3f1   : > { %v2276_v47 = vadd.f32 %v2275_v15, %v2245_v30 }
 0x3f2   : > { %v2214_v5 = vpop.permute.xlu1 %2213 }
 0x3f3   : > { %v2247_v10 = vmul.f32 %v2214_v5, %v2022_v26  ;;  %v2277_v25 = vadd.f32 %v2276_v47, %v2246_v16 }
 0x3f5   : > { %v2278_v58 = vadd.f32 %v2277_v25, %v2247_v10 }
 0x3f7   : > { %v2279_v55 = vrot.slane %v2278_v58, 4 }
 0x3f9   : > { %v2280_v51 = vadd.f32 %v2279_v55, %v2278_v58 }
 0x3fb   : > { %v2281_v23 = vrot.slane %v2280_v51, 2 }
 0x3fd   : > { %v2282_v62 = vadd.f32 %v2281_v23, %v2280_v51 }
 0x3ff   : > { %v2283_v35 = vrot.slane %v2282_v62, 1 }
 0x401   : > { %v2284_v41 = vadd.f32 %v2283_v35, %v2282_v62 }
 0x403   : > { %v2285_v3 = vadd.f32 %v2284_v41, %v2023_v12 }
 0x405   : > { %2286 = vst [vmem:[#allocation4] sm:$0x1] %v2285_v3 }
 0x406 PF: > { %2290 = sbr.rel (!%p1260_p6) target bundleno = 1593 (0x639), region = 64  ;;  %v2292_v42 = vld [vmem:[%s4057_s4] sm:$0xff] (%p1260_p6)  ;;  %v2293_v14 = vld [vmem:[%s4057_s4 + $0x8] sm:$0xff] (%p1260_p6)  ;;  %v2294_v37 = vld [vmem:[%s4057_s4 + $0x10] sm:$0xff] (%p1260_p6)  ;;  %v3066_v8 = vmov (%p1260_p6), 0.0|0.0   ;;  %vm3067_vm5 = vmmov (%p1260_p6), 0  }
 0x407   : > { %2676 = vmatprep.subr.bf16.mxu0 (%p1260_p6), %v3066_v8  ;;  %v2677_v13 = vpack.c.bf16 (%p1260_p6), %v2293_v14, %v2292_v42  ;;  %v2295_v31 = vld [vmem:[%s4057_s4 + $0x18] sm:$0xff] (%p1260_p6)  ;;  %v3068_v59 = vmov (%p1260_p6), 0.0   ;;  %v2296_v9 = vld [vmem:[%s4057_s4 + $0x20] sm:$0xff] (%p1260_p6)  ;;  %v2297_v29 = vld [vmem:[%s4057_s4 + $0x28] sm:$0xff] (%p1260_p6)  ;;  %vm2379_vm6 = vcmask (%p1260_p6), 1040384  }
 0x408   : > { %2673 = vmatprep.mubr.msk.f32.mxu0 (%p1260_p6), %vm3067_vm5, %v3068_v59  ;;  %v2680_v56 = vpack.c.bf16 (%p1260_p6), %v2295_v31, %v2294_v37  ;;  %v2683_v22 = vpack.c.bf16 (%p1260_p6), %v2297_v29, %v2296_v9  ;;  %v2298_v7 = vld [vmem:[%s4057_s4 + $0x30] sm:$0xff] (%p1260_p6)  ;;  %v2299_v38 = vld [vmem:[%s4057_s4 + $0x38] sm:$0xff] (%p1260_p6)  ;;  %v2300_v17 = vld [vmem:[%s4057_s4 + $0x40] sm:$0xff] (%p1260_p6) }
 0x409   : > { %2678 = vmatpush3.bf16.msra.mxu0 (%p1260_p6), %v2677_v13  ;;  %v2686_v46 = vpack.c.bf16 (%p1260_p6), %v2299_v38, %v2298_v7  ;;  %v2301_v21 = vld [vmem:[%s4057_s4 + $0x48] sm:$0xff] (%p1260_p6)  ;;  %v2302_v4 = vld [vmem:[%s4057_s4 + $0x50] sm:$0xff] (%p1260_p6)  ;;  %v2303_v48 = vld [vmem:[%s4057_s4 + $0x58] sm:$0xff] (%p1260_p6) }
 0x40a   : > { %2679 = vmatprep.subr.bf16.mxu0 (%p1260_p6), %v3066_v8  ;;  %v2689_v19 = vpack.c.bf16 (%p1260_p6), %v2301_v21, %v2300_v17  ;;  %v2692_v50 = vpack.c.bf16 (%p1260_p6), %v2303_v48, %v2302_v4  ;;  %v2304_v40 = vld [vmem:[%s4057_s4 + $0x60] sm:$0xff] (%p1260_p6)  ;;  %v2305_v60 = vld [vmem:[%s4057_s4 + $0x68] sm:$0xff] (%p1260_p6)  ;;  %v2306_v63 = vld [vmem:[%s4057_s4 + $0x70] sm:$0xff] (%p1260_p6) }
 0x40b   : > { %v2695_v57 = vpack.c.bf16 (%p1260_p6), %v2305_v60, %v2304_v40  ;;  %v2307_v18 = vld [vmem:[%s4057_s4 + $0x78] sm:$0xff] (%p1260_p6)  ;;  %v2308_v36 = vld [vmem:[%s4058_s5] sm:$0x1] (%p1260_p6) }
 0x40c   : > { %v2698_v54 = vpack.c.bf16 (%p1260_p6), %v2307_v18, %v2306_v63  ;;  %v2291_v20 = vld [vmem:[#allocation4] sm:$0x1] (%p1260_p6) }
 0x40d   : > { %2681 = vmatpush3.bf16.msra.mxu0 %v2680_v56 }
 0x40e   : > { %2682 = vmatprep.subr.bf16.mxu0 %v3066_v8 }
 0x411   : > { %2684 = vmatpush3.bf16.msra.mxu0 %v2683_v22 }
 0x412   : > { %2685 = vmatprep.subr.bf16.mxu0 %v3066_v8 }
 0x415   : > { %2687 = vmatpush3.bf16.msra.mxu0 %v2686_v46 }
 0x416   : > { %2688 = vmatprep.subr.bf16.mxu0 %v3066_v8 }
 0x419   : > { %2690 = vmatpush3.bf16.msra.mxu0 %v2689_v19 }
 0x41a   : > { %2691 = vmatprep.subr.bf16.mxu0 %v3066_v8 }
 0x41d   : > { %2693 = vmatpush3.bf16.msra.mxu0 %v2692_v50 }
 0x41e   : > { %2694 = vmatprep.subr.bf16.mxu0 %v3066_v8 }
 0x421   : > { %2696 = vmatpush3.bf16.msra.mxu0 %v2695_v57 }
 0x422   : > { %2697 = vmatprep.subr.bf16.mxu0 %v3066_v8 }
 0x425   : > { %2699 = vmatpush3.bf16.msra.mxu0 %v2698_v54 }
 0x428   : > { %2674 = vmatmul.mubr.f32.vlgmr.msra.gmra.mrb[0].mxu0 %v2291_v20 }
 0x4fb   : > { %v2375_v61 = vpop.f32.mrb[0].mxu0 }
 0x4fc   : > { %v2376_v24 = vadd.f32 %v2375_v61, %v2308_v36  ;;  %v2675_v6 = vpop.f32.mrb[1].mxu0 }
 0x4fe   : > { %v2380_v1 = vsel %vm2379_vm6, %v2376_v24, -inf }
 0x4ff   : > { %2381 = vmax.xlane.f32.xlu0 %v2380_v1 }
 0x58c   : > { %v2382_v44 = vpop.xlane.xlu0 %2381 }
 0x58d   : > { %v2383_v39 = vsub.f32 %v2376_v24, %v2382_v44 }
 0x58f   : > { %v2384_v32 = vmul.f32 1.442695, %v2383_v39 }
 0x591   : > { %2970 = vpow2.f32 %v2384_v32 }
 0x59b   : > { %v2971_v2 = vpop.eup %2970 }
 0x59c   : > { %v2386_v27 = vsel %vm2379_vm6, %v2971_v2, 0.0 }
 0x59d   : > { %2387 = vadd.xlane.f32.xlu0 %v2386_v27 }
 0x62a   : > { %v2388_v33 = vpop.xlane.xlu0 %2387 }
 0x62b   : > { %2972 = vrcp.f32 %v2388_v33 }
 0x635   : > { %v2973_v28 = vpop.eup %2972 }
 0x636   : > { %v2390_v0 = vmul.f32 %v2973_v28, %v2971_v2 }
 0x638   : > { %2391 = vst [vmem:[#allocation9] sm:$0x1] %v2390_v0 }
 0x639 PF: > { %p4018_p10 = scmp.eq.s32.totalorder %s2475_s24, 1  ;;  %s3069_s19 = smov [#allocation9]  }
 0x63a   : > { %s2399_s20 = sshll.u32 %s3069_s19, 4  ;;  %s2400_s20 = int_to_ptr.vmem [resolvable:$true] %s2399_s20 }
 0x63b   : > { %s3002_s26 = scalar_lea.vmem %s2400_s20, 16  ;;  %s3008_s27 = scalar_lea.vmem %s2400_s20, 32 }
 0x63c   : > { %p3003_p11 = scmp.ne.s32.totalorder %s2400_s20, %s3002_s26  ;;  %p3009_p0 = scmp.lt.s32.totalorder %s2400_s20, %s2400_s20 }
 0x63d   : > { %p3010_p1 = scmp.lt.s32.totalorder %s3008_s27, %s3002_s26 }
 0x63e   : > { %p3004_p12 = pnand %p3003_p11, %p4018_p10 }
 0x63f   : > { %p3011_p2 = por %p3010_p1, %p3009_p0 }
 0x640   : > { %p3005_p13 = pneg %p3004_p12 }
 0x642   : > { %p3012_p5 = pnand %p3011_p2, %p3005_p13 }
 0x644   : > { %3015 = shalt.err (!%p3012_p5)
}
 0x645   : > { %s3016_s29 = scalar_lea.hbm %s4059_s6, 16 }
 0x646   : > { %p3017_p7 = scmp.ne.s32.totalorder %s4059_s6, %s3016_s29  ;;  %p3022_p3 = scmp.lt.u32.totalorder %s3016_s29, %s4059_s6 }
 0x648   : > { %p3018_p9 = pnand %p3017_p7, %p4018_p10 }
 0x64a   : > { %p3019_p4 = pneg %p3018_p9 }
 0x64c   : > { %p3024_p6 = pnand %p3022_p3, %p3019_p4 }
 0x64e   : > { %3027 = shalt.err (!%p3024_p6)
}
 0x64f   : > { %2721 = dma.vmem_to_hbm [thread:$0]  (%p4018_p10), %s2400_s20, 16, %s4059_s6, [#allocation8]  }
 0x650   : > { %3045 = dma.done.wait (%p4018_p10), [#allocation8], 16  }
 0x651   : > { %3047 = vsyncadd (%p4018_p10), [#allocation8], 4294967280 }
 0x652 PF: > { %s18_s23 = sadd.s32 1, %s3058_s23   ;;  %s4069_s21 = smov %s3054_s22 }
 0x653   : > { %p15_p8 = scmp.ge.s32.totalorder %s18_s23, 4   ;;  %s4070_s22 = smov %s4072_s25 }
 0x655   :  { %17 = sbr.rel (!%p15_p8) target bundleno = 3 (0x3), region = 97 }
 0x65c   :  { %2412 = vsyncpa [#allocation7], 1 }
 0x65d   :  { %2414 = vsyncpa [#allocation7 + $0x1], 1 }
 0x65e   :  { %2415 = vsyncpa [#allocation8], 1 }
 0x65f   :  { %2417 = vsyncpa [#allocation8 + $0x1], 1 }

</bundles_post_ra>
